<compile_context>
chip_gen: v7x
topology: tpu7x:2x2x1
jax: 0.10.0
libtpu: 0.0.40
codegen_flags: <defaults>
</compile_context>

<pallas_src>
import functools

import jax
import jax.numpy as jnp
from jax import lax
from jax.experimental import pallas as pl
from jax.experimental.pallas import tpu as pltpu

VMEM_LIMIT = 32 * 1024 * 1024   # scoped VMEM; tiles below use only a few MiB, fits v5e/v6e/v7x


def _round_up(n, m):
    return ((n + m - 1) // m) * m


def _pick_tile(dim, cap):
    """Largest (8,128)-aligned tile <= cap dividing dim (dim is always a multiple of 128)."""
    for t in (512, 384, 256, 128):
        if t <= cap and t <= dim and dim % t == 0:
            return t
    return dim


# ---------------- Kernel 1: filter matrix  M = I - 0.5 * D^{-1/2} (D - A) D^{-1/2} ----------------
def _build_filter_kernel(a_ref, dis_row_ref, dis_col_ref, diag_ref, m_ref):
    tm, tn = a_ref.shape
    # 0.5 * D^{-1/2} A D^{-1/2}  (off-diagonal part, single elementwise pass over the A tile)
    base = 0.5 * dis_row_ref[...] * a_ref[...] * dis_col_ref[...]
    i0 = pl.program_id(0) * tm
    j0 = pl.program_id(1) * tn
    rows = i0 + lax.broadcasted_iota(jnp.int32, (tm, tn), 0)
    cols = j0 + lax.broadcasted_iota(jnp.int32, (tm, tn), 1)
    # diagonal term 1 - 0.5 * d / (d + eps)  (matches the reference 1e-12-eps formula exactly)
    m_ref[...] = jnp.where(rows == cols, base + diag_ref[...], base)


def build_filter_matrix(A, dis, diag_val):
    Np = A.shape[0]
    tm = _pick_tile(Np, 256)
    tn = _pick_tile(Np, 512)
    return pl.pallas_call(
        _build_filter_kernel,
        out_shape=jax.ShapeDtypeStruct((Np, Np), jnp.float32),
        grid_spec=pltpu.PrefetchScalarGridSpec(
            num_scalar_prefetch=0,
            grid=(Np // tm, Np // tn),
            in_specs=[pl.BlockSpec((tm, tn), lambda i, j: (i, j)),
                      pl.BlockSpec((tm, 1), lambda i, j: (i, 0)),
                      pl.BlockSpec((1, tn), lambda i, j: (0, j)),
                      pl.BlockSpec((tm, 1), lambda i, j: (i, 0))],
            out_specs=pl.BlockSpec((tm, tn), lambda i, j: (i, j))),
        compiler_params=pltpu.CompilerParams(
            dimension_semantics=("parallel", "parallel"),
            vmem_limit_bytes=VMEM_LIMIT),
    )(A, dis.reshape(Np, 1), dis.reshape(1, Np), diag_val.reshape(Np, 1))


# ---------------------------- Kernel 2: generic tiled MXU matmul ----------------------------
def _matmul_kernel(a_ref, b_ref, o_ref, acc_ref):
    @pl.when(pl.program_id(2) == 0)
    def _():
        acc_ref[...] = jnp.zeros_like(acc_ref)

    acc_ref[...] += jnp.dot(a_ref[...], b_ref[...], preferred_element_type=jnp.float32)

    @pl.when(pl.program_id(2) == pl.num_programs(2) - 1)
    def _():
        o_ref[...] = acc_ref[...].astype(o_ref.dtype)


def matmul(a, b):
    M, K = a.shape
    K2, N = b.shape
    assert K == K2
    tm = _pick_tile(M, 256)
    tn = _pick_tile(N, 512)
    tk = _pick_tile(K, 512)
    return pl.pallas_call(
        _matmul_kernel,
        out_shape=jax.ShapeDtypeStruct((M, N), jnp.float32),
        grid_spec=pltpu.PrefetchScalarGridSpec(
            num_scalar_prefetch=0,
            grid=(M // tm, N // tn, K // tk),
            in_specs=[pl.BlockSpec((tm, tk), lambda i, j, k: (i, k)),
                      pl.BlockSpec((tk, tn), lambda i, j, k: (k, j))],
            out_specs=pl.BlockSpec((tm, tn), lambda i, j, k: (i, j)),
            scratch_shapes=[pltpu.VMEM((tm, tn), jnp.float32)]),
        compiler_params=pltpu.CompilerParams(
            dimension_semantics=("parallel", "parallel", "arbitrary"),
            vmem_limit_bytes=VMEM_LIMIT),
    )(a, b)


# ------- Kernel 3: thresholded cosine-similarity graph (symmetrized) + row degrees -------
def _sim_w_kernel(yn_i_ref, yn_j_ref, mask_ref, w_ref, deg_ref, *, threshold):
    @pl.when(pl.program_id(1) == 0)
    def _():
        deg_ref[...] = jnp.zeros_like(deg_ref)

    # cosine similarity tile: Yn_i @ Yn_j^T, contraction along the lane-dense feature axis
    sim = lax.dot_general(yn_i_ref[...], yn_j_ref[...],
                          (((1,), (1,)), ((), ())),
                          preferred_element_type=jnp.float32)        # (tm, tn)
    code = mask_ref[...].astype(jnp.int32)                           # bit0: A!=0, bit1: A.T!=0
    has_any = code > 0
    has_both = code == 3
    keep = sim > threshold
    # exact max(W, W.T) semantics: one-directional edges clamp negative sims to 0
    val = jnp.where(has_both, sim, jnp.maximum(sim, 0.0))
    w = jnp.where(has_any & keep, val, 0.0)
    w_ref[...] = w
    deg_ref[...] += jnp.sum(w, axis=1, keepdims=True)


def sim_threshold_graph(Yn, mask_code, threshold):
    Np, FP = Yn.shape
    tm = _pick_tile(Np, 256)
    tn = _pick_tile(Np, 512)
    return pl.pallas_call(
        functools.partial(_sim_w_kernel, threshold=threshold),
        out_shape=(jax.ShapeDtypeStruct((Np, Np), jnp.float32),
                   jax.ShapeDtypeStruct((Np, 1), jnp.float32)),
        grid_spec=pltpu.PrefetchScalarGridSpec(
            num_scalar_prefetch=0,
            grid=(Np // tm, Np // tn),
            in_specs=[pl.BlockSpec((tm, FP), lambda i, j: (i, 0)),
                      pl.BlockSpec((tn, FP), lambda i, j: (j, 0)),
                      pl.BlockSpec((tm, tn), lambda i, j: (i, j))],
            out_specs=[pl.BlockSpec((tm, tn), lambda i, j: (i, j)),
                       pl.BlockSpec((tm, 1), lambda i, j: (i, 0))]),
        compiler_params=pltpu.CompilerParams(
            dimension_semantics=("parallel", "arbitrary"),
            vmem_limit_bytes=VMEM_LIMIT),
    )(Yn, Yn, mask_code)


# ------------------------------------ jitted core ------------------------------------
@functools.partial(jax.jit, static_argnames=("k", "threshold"))
def _cmg_core(edge_index, X_rand, *, k, threshold):
    N, filter_dim = X_rand.shape
    Npad = _round_up(N, 128)
    FP = _round_up(filter_dim, 128)

    # dense adjacency (duplicate-summed scatter, padded to Npad)
    A = jnp.zeros((Npad, Npad), jnp.float32).at[edge_index[0], edge_index[1]].add(1.0)

    # degrees / D^{-1/2} / diagonal of the filter matrix (single O(N^2) XLA pass + O(N) vectors)
    d = jnp.sum(A, axis=1)
    dis = lax.rsqrt(d + 1e-12)                        # matches reference 1/sqrt(d + 1e-12)
    diag_val = 1.0 - 0.5 * d * dis * dis              # = 1 - 0.5 * d / (d + eps)

    # filter matrix (Pallas, tiled)
    M_filt = build_filter_matrix(A, dis, diag_val)

    # spectral power chain  Y = M^{k+1} X - M^k X   (Pallas tiled matmuls, lane-padded X)
    Xp = jnp.zeros((Npad, FP), jnp.float32).at[:N, :filter_dim].set(X_rand)
    pk = Xp
    for _ in range(k):
        pk = matmul(M_filt, pk)
    Y = matmul(M_filt, pk) - pk

    # row-normalize (cosine similarity numerator computed in the Pallas kernel)
    sq = jnp.sum(Y * Y, axis=1, keepdims=True)
    inv_norm = jnp.where(sq > 0.0, lax.rsqrt(sq), 0.0)
    Yn = Y * inv_norm

    # single int8 mask stream carrying both edge-direction bits
    mask_code = (A > 0.0).astype(jnp.int8) + 2 * (A.T > 0.0).astype(jnp.int8)

    # thresholded, symmetrized similarity graph + degrees (Pallas, tiled)
    W, deg = sim_threshold_graph(Yn, mask_code, float(threshold))

    # Laplacian of the new graph: L = diag(deg) - W  (O(N) diagonal scatter, no eye matrix)
    idx = jnp.arange(Npad)
    L = (-W).at[idx, idx].add(deg[:, 0])

    # TODO(synk): cmgx.core.cmgCluster (combinatorial multigrid clustering) has no Pallas
    # equivalent; a deterministic modulo cluster assignment is used as a stand-in.
    nc = max(2, N // 4)
    ncp = _round_up(nc, 128)
    cI = jnp.arange(N, dtype=jnp.int32) % nc
    P_real = jax.nn.one_hot(cI, nc, dtype=jnp.float32)                       # (N, nc)
    P_pad = jnp.zeros((Npad, ncp), jnp.float32).at[:N, :nc].set(P_real)

    # coarsened Laplacian L_c = P^T L P  (Pallas tiled matmuls; P pre-transposed, lane-dense)
    Pt = P_pad.T
    Lc_pad = matmul(matmul(Pt, L), P_pad)
    L_coarse = Lc_pad[:nc, :nc]

    return P_real, L_coarse


# ------------------------------------ forward glue ------------------------------------
def cmg_filtered_pooling_forward(x, edge_index, X_rand, *, k=2, threshold=0.1):
    N = x.shape[0]
    batch = jnp.zeros((N,), dtype=jnp.int32)

    P, L_coarse = _cmg_core(edge_index, X_rand.astype(jnp.float32),
                            k=int(k), threshold=float(threshold))

    # Data-dependent nonzero extraction kept OUTSIDE the jitted/Pallas hot path (the jitted
    # core above returns the dense (nc, nc) coarse Laplacian asynchronously).
    rows, cols = jnp.nonzero(jnp.abs(L_coarse) > 0.0)
    edge_index_c = jnp.stack([rows, cols]).astype(jnp.int32)

    return x, edge_index_c, batch, P, L_coarse


if __name__ == "__main__":
    key = jax.random.PRNGKey(0)
    N, F_in, filter_dim = 16, 8, 20       # small shapes; filter_dim matches module default
    kx, kr = jax.random.split(key)
    x = jax.random.normal(kx, (N, F_in), dtype=jnp.float32)
    X_rand = jax.random.normal(kr, (N, filter_dim), dtype=jnp.float32)

    # deterministic ring graph, both directions
    src = jnp.arange(N, dtype=jnp.int32)
    dst = (src + 1) % N
    edge_index = jnp.stack([jnp.concatenate([src, dst]),
                            jnp.concatenate([dst, src])])

    x_out, edge_index_c, batch, P, L_coarse = cmg_filtered_pooling_forward(
        x, edge_index, X_rand, k=2, threshold=0.1)

    jax.block_until_ready((x_out, edge_index_c, batch, P, L_coarse))
    print("KERNEL_OK")
</pallas_src>

<mosaic_0001>
module attributes {stable_mosaic.version = 11 : i64} {
  func.func private @main(%arg0: i32) attributes {dimension_semantics = [#tpu.dimension_semantics<core_parallel>], iteration_bounds = array<i64: 2>, tpu.core_type = #tpu.core_type<sc_scalar_subcore>, window_params = []} {
    return
  }
}

module attributes {stable_mosaic.version = 11 : i64} {
  func.func private @main(%arg0: i32) attributes {dimension_semantics = [#tpu.dimension_semantics<core_parallel>], iteration_bounds = array<i64: 2>, tpu.core_type = #tpu.core_type<sc_scalar_subcore>, window_params = []} {
    return
  }
}

module attributes {stable_mosaic.version = 11 : i64} {
  func.func @_matmul_kernel(%arg0: i32, %arg1: i32, %arg2: i32, %arg3: memref<128x128xf32, #tpu.memory_space<vmem>>, %arg4: memref<128x128xf32, #tpu.memory_space<vmem>>, %arg5: memref<128x128xf32, #tpu.memory_space<vmem>>, %arg6: memref<128x128xf32, #tpu.memory_space<vmem>>) attributes {dimension_semantics = [#tpu.dimension_semantics<parallel>, #tpu.dimension_semantics<parallel>, #tpu.dimension_semantics<arbitrary>], iteration_bounds = array<i64: 1, 1, 1>, scalar_prefetch = 0 : i64, scratch_operands = 1 : i64, tpu.core_type = #tpu.core_type<tc>, window_params = [{transform_indices = @transform_0, window_bounds = array<i64: 128, 128>}, {transform_indices = @transform_1, window_bounds = array<i64: 128, 128>}, {transform_indices = @transform_2, window_bounds = array<i64: 128, 128>}]} {
    %c0_i32 = arith.constant 0 : i32
    %0 = arith.cmpi eq, %arg2, %c0_i32 : i32
    %1 = arith.extui %0 : i1 to i32
    %c0_i32_0 = arith.constant 0 : i32
    %2 = arith.cmpi ne, %1, %c0_i32_0 : i32
    scf.if %2 {
      %cst_10 = arith.constant 0.000000e+00 : f32
      %12 = vector.broadcast %cst_10 : f32 to vector<128x128xf32>
      %c0_11 = arith.constant 0 : index
      %c0_12 = arith.constant 0 : index
      %13 = vector.load %arg6[%c0_11, %c0_12] : memref<128x128xf32, #tpu.memory_space<vmem>>, vector<128x128xf32>
      tpu.vector_store %arg6[%c0_11, %c0_12], %12 {strides = array<i32>} : memref<128x128xf32, #tpu.memory_space<vmem>>, vector<128x128xf32>,
    } else {
    }
    %c0 = arith.constant 0 : index
    %c0_1 = arith.constant 0 : index
    %3 = vector.load %arg6[%c0, %c0_1] : memref<128x128xf32, #tpu.memory_space<vmem>>, vector<128x128xf32>
    %c0_2 = arith.constant 0 : index
    %c0_3 = arith.constant 0 : index
    %4 = vector.load %arg3[%c0_2, %c0_3] : memref<128x128xf32, #tpu.memory_space<vmem>>, vector<128x128xf32>
    %c0_4 = arith.constant 0 : index
    %c0_5 = arith.constant 0 : index
    %5 = vector.load %arg4[%c0_4, %c0_5] : memref<128x128xf32, #tpu.memory_space<vmem>>, vector<128x128xf32>
    %cst = arith.constant dense<0.000000e+00> : vector<128x128xf32>
    %6 = tpu.matmul %4, %5, %cst {dimension_numbers = #tpu.dot_dimension_numbers<[1], [0], [0], [1], [0, 0, 1, 1], [], []>} : vector<128x128xf32>, vector<128x128xf32>, vector<128x128xf32> -> vector<128x128xf32>
    %7 = arith.addf %3, %6 : vector<128x128xf32>
    %c0_6 = arith.constant 0 : index
    %c0_7 = arith.constant 0 : index
    %8 = vector.load %arg6[%c0_6, %c0_7] : memref<128x128xf32, #tpu.memory_space<vmem>>, vector<128x128xf32>
    tpu.vector_store %arg6[%c0_6, %c0_7], %7 {strides = array<i32>} : memref<128x128xf32, #tpu.memory_space<vmem>>, vector<128x128xf32>,
    %c0_i32_8 = arith.constant 0 : i32
    %9 = arith.cmpi eq, %arg2, %c0_i32_8 : i32
    %10 = arith.extui %9 : i1 to i32
    %c0_i32_9 = arith.constant 0 : i32
    %11 = arith.cmpi ne, %10, %c0_i32_9 : i32
    scf.if %11 {
      %c0_10 = arith.constant 0 : index
      %c0_11 = arith.constant 0 : index
      %12 = vector.load %arg6[%c0_10, %c0_11] : memref<128x128xf32, #tpu.memory_space<vmem>>, vector<128x128xf32>
      %c0_12 = arith.constant 0 : index
      %c0_13 = arith.constant 0 : index
      %13 = vector.load %arg5[%c0_12, %c0_13] : memref<128x128xf32, #tpu.memory_space<vmem>>, vector<128x128xf32>
      tpu.vector_store %arg5[%c0_12, %c0_13], %12 {strides = array<i32>} : memref<128x128xf32, #tpu.memory_space<vmem>>, vector<128x128xf32>,
    } else {
    }
    return
  }
  func.func @transform_0(%arg0: i32, %arg1: i32, %arg2: i32) -> (i32, i32) {
    %c0_i32 = arith.constant 0 : i32
    return %arg0, %arg2 : i32, i32
  }
  func.func @transform_1(%arg0: i32, %arg1: i32, %arg2: i32) -> (i32, i32) {
    %c0_i32 = arith.constant 0 : i32
    return %arg2, %arg1 : i32, i32
  }
  func.func @transform_2(%arg0: i32, %arg1: i32, %arg2: i32) -> (i32, i32) {
    %c0_i32 = arith.constant 0 : i32
    return %arg0, %arg1 : i32, i32
  }
}

module attributes {stable_mosaic.version = 11 : i64} {
  func.func @_build_filter_kernel(%arg0: i32, %arg1: i32, %arg2: memref<128x128xf32, #tpu.memory_space<vmem>>, %arg3: memref<128x1xf32, #tpu.memory_space<vmem>>, %arg4: memref<1x128xf32, #tpu.memory_space<vmem>>, %arg5: memref<128x1xf32, #tpu.memory_space<vmem>>, %arg6: memref<128x128xf32, #tpu.memory_space<vmem>>) attributes {dimension_semantics = [#tpu.dimension_semantics<parallel>, #tpu.dimension_semantics<parallel>], iteration_bounds = array<i64: 1, 1>, scalar_prefetch = 0 : i64, scratch_operands = 0 : i64, tpu.core_type = #tpu.core_type<tc>, window_params = [{transform_indices = @transform_0, window_bounds = array<i64: 128, 128>}, {transform_indices = @transform_1, window_bounds = array<i64: 128, 1>}, {transform_indices = @transform_2, window_bounds = array<i64: 1, 128>}, {transform_indices = @transform_3, window_bounds = array<i64: 128, 1>}, {transform_indices = @transform_4, window_bounds = array<i64: 128, 128>}]} {
    %c0 = arith.constant 0 : index
    %c0_0 = arith.constant 0 : index
    %0 = vector.load %arg3[%c0, %c0_0] : memref<128x1xf32, #tpu.memory_space<vmem>>, vector<128x1xf32>
    %cst = arith.constant 5.000000e-01 : f32
    %1 = vector.broadcast %cst : f32 to vector<128x1xf32>
    %2 = arith.mulf %1, %0 : vector<128x1xf32>
    %c0_1 = arith.constant 0 : index
    %c0_2 = arith.constant 0 : index
    %3 = vector.load %arg2[%c0_1, %c0_2] : memref<128x128xf32, #tpu.memory_space<vmem>>, vector<128x128xf32>
    %4 = vector.broadcast %2 : vector<128x1xf32> to vector<128x128xf32>
    %5 = arith.mulf %4, %3 : vector<128x128xf32>
    %c0_3 = arith.constant 0 : index
    %c0_4 = arith.constant 0 : index
    %6 = vector.load %arg4[%c0_3, %c0_4] : memref<1x128xf32, #tpu.memory_space<vmem>>, vector<1x128xf32>
    %7 = vector.broadcast %6 : vector<1x128xf32> to vector<128x128xf32>
    %8 = arith.mulf %5, %7 : vector<128x128xf32>
    %c128_i32 = arith.constant 128 : i32
    %9 = arith.muli %arg0, %c128_i32 : i32
    %c128_i32_5 = arith.constant 128 : i32
    %10 = arith.muli %arg1, %c128_i32_5 : i32
    %11 = tpu.iota {dimensions = array<i32: 0>} : vector<128x128xi32>
    %12 = vector.broadcast %9 : i32 to vector<128x128xi32>
    %13 = arith.addi %12, %11 : vector<128x128xi32>
    %14 = tpu.iota {dimensions = array<i32: 1>} : vector<128x128xi32>
    %15 = vector.broadcast %10 : i32 to vector<128x128xi32>
    %16 = arith.addi %15, %14 : vector<128x128xi32>
    %17 = arith.cmpi eq, %13, %16 : vector<128x128xi32>
    %c0_6 = arith.constant 0 : index
    %c0_7 = arith.constant 0 : index
    %18 = vector.load %arg5[%c0_6, %c0_7] : memref<128x1xf32, #tpu.memory_space<vmem>>, vector<128x1xf32>
    %19 = vector.broadcast %18 : vector<128x1xf32> to vector<128x128xf32>
    %20 = arith.addf %8, %19 : vector<128x128xf32>
    %21 = arith.select %17, %20, %8 : vector<128x128xi1>, vector<128x128xf32>
    %c0_8 = arith.constant 0 : index
    %c0_9 = arith.constant 0 : index
    %22 = vector.load %arg6[%c0_8, %c0_9] : memref<128x128xf32, #tpu.memory_space<vmem>>, vector<128x128xf32>
    tpu.vector_store %arg6[%c0_8, %c0_9], %21 {strides = array<i32>} : memref<128x128xf32, #tpu.memory_space<vmem>>, vector<128x128xf32>,
    return
  }
  func.func @transform_0(%arg0: i32, %arg1: i32) -> (i32, i32) {
    %c0_i32 = arith.constant 0 : i32
    return %arg0, %arg1 : i32, i32
  }
  func.func @transform_1(%arg0: i32, %arg1: i32) -> (i32, i32) {
    %c0_i32 = arith.constant 0 : i32
    %c0_i32_0 = arith.constant 0 : i32
    return %arg0, %c0_i32 : i32, i32
  }
  func.func @transform_2(%arg0: i32, %arg1: i32) -> (i32, i32) {
    %c0_i32 = arith.constant 0 : i32
    %c0_i32_0 = arith.constant 0 : i32
    return %c0_i32, %arg1 : i32, i32
  }
  func.func @transform_3(%arg0: i32, %arg1: i32) -> (i32, i32) {
    %c0_i32 = arith.constant 0 : i32
    %c0_i32_0 = arith.constant 0 : i32
    return %arg0, %c0_i32 : i32, i32
  }
  func.func @transform_4(%arg0: i32, %arg1: i32) -> (i32, i32) {
    %c0_i32 = arith.constant 0 : i32
    return %arg0, %arg1 : i32, i32
  }
}

module attributes {stable_mosaic.version = 11 : i64} {
  func.func @_sim_w_kernel(%arg0: i32, %arg1: i32, %arg2: memref<128x128xf32, #tpu.memory_space<vmem>>, %arg3: memref<128x128xf32, #tpu.memory_space<vmem>>, %arg4: memref<128x128xi8, #tpu.memory_space<vmem>>, %arg5: memref<128x128xf32, #tpu.memory_space<vmem>>, %arg6: memref<128x1xf32, #tpu.memory_space<vmem>>) attributes {dimension_semantics = [#tpu.dimension_semantics<parallel>, #tpu.dimension_semantics<arbitrary>], iteration_bounds = array<i64: 1, 1>, scalar_prefetch = 0 : i64, scratch_operands = 0 : i64, tpu.core_type = #tpu.core_type<tc>, window_params = [{transform_indices = @transform_0, window_bounds = array<i64: 128, 128>}, {transform_indices = @transform_1, window_bounds = array<i64: 128, 128>}, {transform_indices = @transform_2, window_bounds = array<i64: 128, 128>}, {transform_indices = @transform_3, window_bounds = array<i64: 128, 128>}, {transform_indices = @transform_4, window_bounds = array<i64: 128, 1>}]} {
    %c0_i32 = arith.constant 0 : i32
    %0 = arith.cmpi eq, %arg1, %c0_i32 : i32
    %1 = arith.extui %0 : i1 to i32
    %c0_i32_0 = arith.constant 0 : i32
    %2 = arith.cmpi ne, %1, %c0_i32_0 : i32
    scf.if %2 {
      %cst_17 = arith.constant 0.000000e+00 : f32
      %26 = vector.broadcast %cst_17 : f32 to vector<128x1xf32>
      %c0_18 = arith.constant 0 : index
      %c0_19 = arith.constant 0 : index
      %27 = vector.load %arg6[%c0_18, %c0_19] : memref<128x1xf32, #tpu.memory_space<vmem>>, vector<128x1xf32>
      tpu.vector_store %arg6[%c0_18, %c0_19], %26 {strides = array<i32>} : memref<128x1xf32, #tpu.memory_space<vmem>>, vector<128x1xf32>,
    } else {
    }
    %c0 = arith.constant 0 : index
    %c0_1 = arith.constant 0 : index
    %3 = vector.load %arg2[%c0, %c0_1] : memref<128x128xf32, #tpu.memory_space<vmem>>, vector<128x128xf32>
    %c0_2 = arith.constant 0 : index
    %c0_3 = arith.constant 0 : index
    %4 = vector.load %arg3[%c0_2, %c0_3] : memref<128x128xf32, #tpu.memory_space<vmem>>, vector<128x128xf32>
    %cst = arith.constant dense<0.000000e+00> : vector<128x128xf32>
    %5 = tpu.matmul %3, %4, %cst {dimension_numbers = #tpu.dot_dimension_numbers<[1], [1], [0], [0], [0, 0, 1, 0], [], []>} : vector<128x128xf32>, vector<128x128xf32>, vector<128x128xf32> -> vector<128x128xf32>
    %c0_4 = arith.constant 0 : index
    %c0_5 = arith.constant 0 : index
    %6 = vector.load %arg4[%c0_4, %c0_5] : memref<128x128xi8, #tpu.memory_space<vmem>>, vector<128x128xi8>
    %7 = arith.extsi %6 : vector<128x128xi8> to vector<128x128xi32>
    %c0_i32_6 = arith.constant 0 : i32
    %8 = vector.broadcast %c0_i32_6 : i32 to vector<128x128xi32>
    %9 = arith.cmpi sgt, %7, %8 : vector<128x128xi32>
    %c3_i32 = arith.constant 3 : i32
    %10 = vector.broadcast %c3_i32 : i32 to vector<128x128xi32>
    %11 = arith.cmpi eq, %7, %10 : vector<128x128xi32>
    %cst_7 = arith.constant 1.000000e-01 : f32
    %12 = vector.broadcast %cst_7 : f32 to vector<128x128xf32>
    %13 = arith.cmpf ogt, %5, %12 : vector<128x128xf32>
    %cst_8 = arith.constant 0.000000e+00 : f32
    %14 = vector.broadcast %cst_8 : f32 to vector<128x128xf32>
    %15 = arith.maximumf %5, %14 : vector<128x128xf32>
    %16 = arith.select %11, %5, %15 : vector<128x128xi1>, vector<128x128xf32>
    %17 = arith.andi %9, %13 : vector<128x128xi1>
    %cst_9 = arith.constant 0.000000e+00 : f32
    %18 = vector.broadcast %cst_9 : f32 to vector<128x128xf32>
    %19 = arith.select %17, %16, %18 : vector<128x128xi1>, vector<128x128xf32>
    %c0_10 = arith.constant 0 : index
    %c0_11 = arith.constant 0 : index
    %20 = vector.load %arg5[%c0_10, %c0_11] : memref<128x128xf32, #tpu.memory_space<vmem>>, vector<128x128xf32>
    tpu.vector_store %arg5[%c0_10, %c0_11], %19 {strides = array<i32>} : memref<128x128xf32, #tpu.memory_space<vmem>>, vector<128x128xf32>,
    %c0_12 = arith.constant 0 : index
    %c0_13 = arith.constant 0 : index
    %21 = vector.load %arg6[%c0_12, %c0_13] : memref<128x1xf32, #tpu.memory_space<vmem>>, vector<128x1xf32>
    %cst_14 = arith.constant dense<0.000000e+00> : vector<128xf32>
    %22 = vector.multi_reduction <add>, %19, %cst_14 [1] : vector<128x128xf32> to vector<128xf32>
    %23 = vector.shape_cast %22 : vector<128xf32> to vector<128x1xf32>
    %24 = arith.addf %21, %23 : vector<128x1xf32>
    %c0_15 = arith.constant 0 : index
    %c0_16 = arith.constant 0 : index
    %25 = vector.load %arg6[%c0_15, %c0_16] : memref<128x1xf32, #tpu.memory_space<vmem>>, vector<128x1xf32>
    tpu.vector_store %arg6[%c0_15, %c0_16], %24 {strides = array<i32>} : memref<128x1xf32, #tpu.memory_space<vmem>>, vector<128x1xf32>,
    return
  }
  func.func @transform_0(%arg0: i32, %arg1: i32) -> (i32, i32) {
    %c0_i32 = arith.constant 0 : i32
    %c0_i32_0 = arith.constant 0 : i32
    return %arg0, %c0_i32 : i32, i32
  }
  func.func @transform_1(%arg0: i32, %arg1: i32) -> (i32, i32) {
    %c0_i32 = arith.constant 0 : i32
    %c0_i32_0 = arith.constant 0 : i32
    return %arg1, %c0_i32 : i32, i32
  }
  func.func @transform_2(%arg0: i32, %arg1: i32) -> (i32, i32) {
    %c0_i32 = arith.constant 0 : i32
    return %arg0, %arg1 : i32, i32
  }
  func.func @transform_3(%arg0: i32, %arg1: i32) -> (i32, i32) {
    %c0_i32 = arith.constant 0 : i32
    return %arg0, %arg1 : i32, i32
  }
  func.func @transform_4(%arg0: i32, %arg1: i32) -> (i32, i32) {
    %c0_i32 = arith.constant 0 : i32
    %c0_i32_0 = arith.constant 0 : i32
    return %arg0, %c0_i32 : i32, i32
  }
}

module attributes {stable_mosaic.version = 11 : i64} {
  func.func @_matmul_kernel(%arg0: i32, %arg1: i32, %arg2: i32, %arg3: memref<128x128xf32, #tpu.memory_space<vmem>>, %arg4: memref<128x128xf32, #tpu.memory_space<vmem>>, %arg5: memref<128x128xf32, #tpu.memory_space<vmem>>, %arg6: memref<128x128xf32, #tpu.memory_space<vmem>>) attributes {dimension_semantics = [#tpu.dimension_semantics<parallel>, #tpu.dimension_semantics<parallel>, #tpu.dimension_semantics<arbitrary>], iteration_bounds = array<i64: 1, 1, 1>, scalar_prefetch = 0 : i64, scratch_operands = 1 : i64, tpu.core_type = #tpu.core_type<tc>, window_params = [{transform_indices = @transform_0, window_bounds = array<i64: 128, 128>}, {transform_indices = @transform_1, window_bounds = array<i64: 128, 128>}, {transform_indices = @transform_2, window_bounds = array<i64: 128, 128>}]} {
    %c0_i32 = arith.constant 0 : i32
    %0 = arith.cmpi eq, %arg2, %c0_i32 : i32
    %1 = arith.extui %0 : i1 to i32
    %c0_i32_0 = arith.constant 0 : i32
    %2 = arith.cmpi ne, %1, %c0_i32_0 : i32
    scf.if %2 {
      %cst_10 = arith.constant 0.000000e+00 : f32
      %12 = vector.broadcast %cst_10 : f32 to vector<128x128xf32>
      %c0_11 = arith.constant 0 : index
      %c0_12 = arith.constant 0 : index
      %13 = vector.load %arg6[%c0_11, %c0_12] : memref<128x128xf32, #tpu.memory_space<vmem>>, vector<128x128xf32>
      tpu.vector_store %arg6[%c0_11, %c0_12], %12 {strides = array<i32>} : memref<128x128xf32, #tpu.memory_space<vmem>>, vector<128x128xf32>,
    } else {
    }
    %c0 = arith.constant 0 : index
    %c0_1 = arith.constant 0 : index
    %3 = vector.load %arg6[%c0, %c0_1] : memref<128x128xf32, #tpu.memory_space<vmem>>, vector<128x128xf32>
    %c0_2 = arith.constant 0 : index
    %c0_3 = arith.constant 0 : index
    %4 = vector.load %arg3[%c0_2, %c0_3] : memref<128x128xf32, #tpu.memory_space<vmem>>, vector<128x128xf32>
    %c0_4 = arith.constant 0 : index
    %c0_5 = arith.constant 0 : index
    %5 = vector.load %arg4[%c0_4, %c0_5] : memref<128x128xf32, #tpu.memory_space<vmem>>, vector<128x128xf32>
    %cst = arith.constant dense<0.000000e+00> : vector<128x128xf32>
    %6 = tpu.matmul %4, %5, %cst {dimension_numbers = #tpu.dot_dimension_numbers<[1], [0], [0], [1], [0, 0, 1, 1], [], []>} : vector<128x128xf32>, vector<128x128xf32>, vector<128x128xf32> -> vector<128x128xf32>
    %7 = arith.addf %3, %6 : vector<128x128xf32>
    %c0_6 = arith.constant 0 : index
    %c0_7 = arith.constant 0 : index
    %8 = vector.load %arg6[%c0_6, %c0_7] : memref<128x128xf32, #tpu.memory_space<vmem>>, vector<128x128xf32>
    tpu.vector_store %arg6[%c0_6, %c0_7], %7 {strides = array<i32>} : memref<128x128xf32, #tpu.memory_space<vmem>>, vector<128x128xf32>,
    %c0_i32_8 = arith.constant 0 : i32
    %9 = arith.cmpi eq, %arg2, %c0_i32_8 : i32
    %10 = arith.extui %9 : i1 to i32
    %c0_i32_9 = arith.constant 0 : i32
    %11 = arith.cmpi ne, %10, %c0_i32_9 : i32
    scf.if %11 {
      %c0_10 = arith.constant 0 : index
      %c0_11 = arith.constant 0 : index
      %12 = vector.load %arg6[%c0_10, %c0_11] : memref<128x128xf32, #tpu.memory_space<vmem>>, vector<128x128xf32>
      %c0_12 = arith.constant 0 : index
      %c0_13 = arith.constant 0 : index
      %13 = vector.load %arg5[%c0_12, %c0_13] : memref<128x128xf32, #tpu.memory_space<vmem>>, vector<128x128xf32>
      tpu.vector_store %arg5[%c0_12, %c0_13], %12 {strides = array<i32>} : memref<128x128xf32, #tpu.memory_space<vmem>>, vector<128x128xf32>,
    } else {
    }
    return
  }
  func.func @transform_0(%arg0: i32, %arg1: i32, %arg2: i32) -> (i32, i32) {
    %c0_i32 = arith.constant 0 : i32
    return %arg0, %arg2 : i32, i32
  }
  func.func @transform_1(%arg0: i32, %arg1: i32, %arg2: i32) -> (i32, i32) {
    %c0_i32 = arith.constant 0 : i32
    return %arg2, %arg1 : i32, i32
  }
  func.func @transform_2(%arg0: i32, %arg1: i32, %arg2: i32) -> (i32, i32) {
    %c0_i32 = arith.constant 0 : i32
    return %arg0, %arg1 : i32, i32
  }
}

</mosaic_0001>

<bundles_post_ra>
// kernel: neg.1
= control target key start
LH: loop header
LB: loop body
LE: loop exit
PB: predicated region body
PF: predicated region fallthrough
CT: control target
= control target key end

     0   :  { %2 = vsyncpa [#allocation1], 0  ;;  %s183_s16 = smov [#allocation0]   ;;  %s259_s0 = inlined_call_operand.vmem [shape: f32[128,128], index: 0, kind: input, shape index: {}]   ;;  %s260_s1 = inlined_call_operand.hbm [shape: f32[128,128], index: 1, kind: output, shape index: {}]  }
   0x1   :  { %v3_v0 = vld [vmem:[%s259_s0] sm:$0xff]  ;;  %v141_v1 = vld [vmem:[%s259_s0 + $0x8] sm:$0xff]  ;;  %v142_v4 = vld [vmem:[%s259_s0 + $0x10] sm:$0xff]  ;;  %s211_s17 = sshll.u32 %s183_s16, 4  ;;  %s133_s17 = int_to_ptr.vmem [resolvable:$true] %s211_s17 }
   0x2   :  { %v6_v2 = vxor.u32 2147483648, %v3_v0  ;;  %v13_v3 = vxor.u32 2147483648, %v141_v1  ;;  %v143_v5 = vld [vmem:[%s259_s0 + $0x18] sm:$0xff]  ;;  %v144_v6 = vld [vmem:[%s259_s0 + $0x20] sm:$0xff]  ;;  %v21_v7 = vxor.u32 2147483648, %v142_v4  ;;  %v145_v10 = vld [vmem:[%s259_s0 + $0x28] sm:$0xff]  ;;  %p164_p1 = scmp.lt.s32.totalorder %s133_s17, %s133_s17 }
   0x3   :  { %v29_v8 = vxor.u32 2147483648, %v143_v5  ;;  %v37_v9 = vxor.u32 2147483648, %v144_v6  ;;  %v146_v11 = vld [vmem:[%s259_s0 + $0x30] sm:$0xff]  ;;  %v147_v12 = vld [vmem:[%s259_s0 + $0x38] sm:$0xff]  ;;  %v45_v13 = vxor.u32 2147483648, %v145_v10  ;;  %v148_v16 = vld [vmem:[%s259_s0 + $0x40] sm:$0xff] }
   0x4   :  { %8 = vst [vmem:[#allocation0] sm:$0xff] %v6_v2  ;;  %16 = vst [vmem:[#allocation0 + $0x8] sm:$0xff] %v13_v3  ;;  %v53_v14 = vxor.u32 2147483648, %v146_v11  ;;  %v61_v15 = vxor.u32 2147483648, %v147_v12  ;;  %v149_v17 = vld [vmem:[%s259_s0 + $0x48] sm:$0xff]  ;;  %v150_v18 = vld [vmem:[%s259_s0 + $0x50] sm:$0xff] }
   0x5   :  { %24 = vst [vmem:[#allocation0 + $0x10] sm:$0xff] %v21_v7  ;;  %32 = vst [vmem:[#allocation0 + $0x18] sm:$0xff] %v29_v8  ;;  %v69_v19 = vxor.u32 2147483648, %v148_v16  ;;  %v77_v20 = vxor.u32 2147483648, %v149_v17  ;;  %v85_v21 = vxor.u32 2147483648, %v150_v18  ;;  %v151_v22 = vld [vmem:[%s259_s0 + $0x58] sm:$0xff] }
   0x6   :  { %40 = vst [vmem:[#allocation0 + $0x20] sm:$0xff] %v37_v9  ;;  %v152_v23 = vld [vmem:[%s259_s0 + $0x60] sm:$0xff]  ;;  %v153_v24 = vld [vmem:[%s259_s0 + $0x68] sm:$0xff]  ;;  %48 = vst [vmem:[#allocation0 + $0x28] sm:$0xff] %v45_v13  ;;  %v93_v25 = vxor.u32 2147483648, %v151_v22 }
   0x7   :  { %56 = vst [vmem:[#allocation0 + $0x30] sm:$0xff] %v53_v14  ;;  %64 = vst [vmem:[#allocation0 + $0x38] sm:$0xff] %v61_v15  ;;  %v101_v26 = vxor.u32 2147483648, %v152_v23  ;;  %v109_v27 = vxor.u32 2147483648, %v153_v24  ;;  %v154_v28 = vld [vmem:[%s259_s0 + $0x70] sm:$0xff]  ;;  %v155_v29 = vld [vmem:[%s259_s0 + $0x78] sm:$0xff] }
   0x8   :  { %72 = vst [vmem:[#allocation0 + $0x40] sm:$0xff] %v69_v19  ;;  %80 = vst [vmem:[#allocation0 + $0x48] sm:$0xff] %v77_v20  ;;  %v117_v30 = vxor.u32 2147483648, %v154_v28  ;;  %v125_v31 = vxor.u32 2147483648, %v155_v29  ;;  %s159_s0 = scalar_lea.vmem %s133_s17, 2048 }
   0x9   :  { %88 = vst [vmem:[#allocation0 + $0x50] sm:$0xff] %v85_v21  ;;  %96 = vst [vmem:[#allocation0 + $0x58] sm:$0xff] %v93_v25  ;;  %p160_p0 = scmp.ne.s32.totalorder %s133_s17, %s159_s0  ;;  %p165_p2 = scmp.lt.s32.totalorder %s159_s0, %s159_s0 }
   0xa   :  { %104 = vst [vmem:[#allocation0 + $0x60] sm:$0xff] %v101_v26  ;;  %112 = vst [vmem:[#allocation0 + $0x68] sm:$0xff] %v109_v27 }
   0xb   :  { %120 = vst [vmem:[#allocation0 + $0x70] sm:$0xff] %v117_v30  ;;  %128 = vst [vmem:[#allocation0 + $0x78] sm:$0xff] %v125_v31  ;;  %p166_p3 = por %p165_p2, %p164_p1 }
   0xd   :  { %p167_p4 = pnand %p166_p3, %p160_p0 }
   0xf   :  { %170 = shalt.err (!%p167_p4)
}
  0x10   :  { %s171_s13 = scalar_lea.hbm %s260_s1, 2048 }
  0x11   :  { %p172_p5 = scmp.ne.s32.totalorder %s260_s1, %s171_s13  ;;  %p175_p6 = scmp.lt.u32.totalorder %s171_s13, %s260_s1 }
  0x13   :  { %p177_p7 = pnand %p175_p6, %p172_p5 }
  0x15   :  { %180 = shalt.err (!%p177_p7)
}
  0x16   :  { %s184_s19 = smov 128   ;;  %s185_s20 = smov 8  }
  0x17   :  { %138 = dma.vmem_to_hbm [thread:$0]  %s133_s17, 2048, %s260_s1, [#allocation1], %s184_s19, %s184_s19, %s185_s20  }
  0x18   :  { %181 = dma.done.wait [#allocation1], 2048  }
  0x19   :  { %182 = vsyncadd [#allocation1], 4294965248 }
  0x1a   :  { %140 = vsyncpa [#allocation1], 1 }

// kernel: _cmg_core.8
= control target key start
LH: loop header
LB: loop body
LE: loop exit
PB: predicated region body
PF: predicated region fallthrough
CT: control target
= control target key end

     0   :  { %s590_s1 = inlined_call_operand.vmem [shape: f32[128,128], index: 1, kind: input, shape index: {}]   ;;  %s591_s0 = inlined_call_operand.vmem [shape: f32[128,128], index: 0, kind: input, shape index: {}]   ;;  %s592_s2 = inlined_call_operand.vmem [shape: f32[128,128], index: 2, kind: output, shape index: {}]  }
   0x1   :  { %v63_v0 = vld [vmem:[%s590_s1] sm:$0xff]  ;;  %v64_v1 = vld [vmem:[%s590_s1 + $0x8] sm:$0xff]  ;;  %v65_v2 = vld [vmem:[%s590_s1 + $0x10] sm:$0xff] }
   0x2   :  { %v383_v3 = vpack.c.bf16 %v64_v1, %v63_v0  ;;  %v66_v4 = vld [vmem:[%s590_s1 + $0x18] sm:$0xff]  ;;  %v67_v6 = vld [vmem:[%s590_s1 + $0x20] sm:$0xff]  ;;  %v68_v7 = vld [vmem:[%s590_s1 + $0x28] sm:$0xff] }
   0x3   :  { %v387_v5 = vpack.c.bf16 %v66_v4, %v65_v2  ;;  %v391_v8 = vpack.c.bf16 %v68_v7, %v67_v6  ;;  %v47_v9 = vld [vmem:[%s591_s0] sm:$0xff]  ;;  %v69_v11 = vld [vmem:[%s590_s1 + $0x30] sm:$0xff]  ;;  %v70_v12 = vld [vmem:[%s590_s1 + $0x38] sm:$0xff] }
   0x4   :  { %384 = vmatprep.subr.bf16.mxu0 %v383_v3  ;;  %415 = vmatprep.subr.bf16.mxu1 %v383_v3  ;;  %v55_v10 = vld [vmem:[%s591_s0 + $0x40] sm:$0xff]  ;;  %v395_v13 = vpack.c.bf16 %v70_v12, %v69_v11  ;;  %v72_v15 = vld [vmem:[%s590_s1 + $0x48] sm:$0xff]  ;;  %v73_v17 = vld [vmem:[%s590_s1 + $0x50] sm:$0xff] }
   0x5   :  { %386 = vmatpush3.bf16.msra.mxu0 %v383_v3  ;;  %423 = vmatpush3.bf16.msra.mxu1 %v383_v3  ;;  %v71_v14 = vld [vmem:[%s590_s1 + $0x40] sm:$0xff]  ;;  %v74_v18 = vld [vmem:[%s590_s1 + $0x58] sm:$0xff]  ;;  %v76_v21 = vld [vmem:[%s590_s1 + $0x68] sm:$0xff] }
   0x6   :  { %388 = vmatprep.subr.bf16.mxu0 %v387_v5  ;;  %416 = vmatprep.subr.bf16.mxu1 %v387_v5  ;;  %v399_v16 = vpack.c.bf16 %v72_v15, %v71_v14  ;;  %v403_v19 = vpack.c.bf16 %v74_v18, %v73_v17  ;;  %v75_v20 = vld [vmem:[%s590_s1 + $0x60] sm:$0xff]  ;;  %v77_v23 = vld [vmem:[%s590_s1 + $0x70] sm:$0xff]  ;;  %v78_v24 = vld [vmem:[%s590_s1 + $0x78] sm:$0xff] }
   0x7   :  { %359 = vmatprep.mubr.f32.mxu0 %v47_v9  ;;  %371 = vmatprep.mubr.f32.mxu1 %v55_v10  ;;  %v407_v22 = vpack.c.bf16 %v76_v21, %v75_v20  ;;  %v411_v25 = vpack.c.bf16 %v78_v24, %v77_v23  ;;  %v48_v26 = vld [vmem:[%s591_s0 + $0x8] sm:$0xff]  ;;  %v49_v28 = vld [vmem:[%s591_s0 + $0x10] sm:$0xff]  ;;  %v50_v30 = vld [vmem:[%s591_s0 + $0x18] sm:$0xff] }
   0x8   :  { %v56_v27 = vld [vmem:[%s591_s0 + $0x48] sm:$0xff]  ;;  %v57_v29 = vld [vmem:[%s591_s0 + $0x50] sm:$0xff]  ;;  %v58_v31 = vld [vmem:[%s591_s0 + $0x58] sm:$0xff] }
   0x9   :  { %390 = vmatpush3.bf16.msra.mxu0 %v387_v5  ;;  %424 = vmatpush3.bf16.msra.mxu1 %v387_v5  ;;  %v51_v32 = vld [vmem:[%s591_s0 + $0x20] sm:$0xff]  ;;  %v52_v34 = vld [vmem:[%s591_s0 + $0x28] sm:$0xff]  ;;  %v53_v36 = vld [vmem:[%s591_s0 + $0x30] sm:$0xff] }
   0xa   :  { %392 = vmatprep.subr.bf16.mxu0 %v391_v8  ;;  %417 = vmatprep.subr.bf16.mxu1 %v391_v8  ;;  %v59_v33 = vld [vmem:[%s591_s0 + $0x60] sm:$0xff]  ;;  %v60_v35 = vld [vmem:[%s591_s0 + $0x68] sm:$0xff]  ;;  %v61_v37 = vld [vmem:[%s591_s0 + $0x70] sm:$0xff] }
   0xb   :  { %v54_v38 = vld [vmem:[%s591_s0 + $0x38] sm:$0xff] }
   0xc   :  { %v62_v39 = vld [vmem:[%s591_s0 + $0x78] sm:$0xff] }
   0xd   :  { %394 = vmatpush3.bf16.msra.mxu0 %v391_v8  ;;  %425 = vmatpush3.bf16.msra.mxu1 %v391_v8 }
   0xe   :  { %396 = vmatprep.subr.bf16.mxu0 %v395_v13  ;;  %418 = vmatprep.subr.bf16.mxu1 %v395_v13 }
  0x11   :  { %398 = vmatpush3.bf16.msra.mxu0 %v395_v13  ;;  %426 = vmatpush3.bf16.msra.mxu1 %v395_v13 }
  0x12   :  { %400 = vmatprep.subr.bf16.mxu0 %v399_v16  ;;  %419 = vmatprep.subr.bf16.mxu1 %v399_v16 }
  0x15   :  { %402 = vmatpush3.bf16.msra.mxu0 %v399_v16  ;;  %427 = vmatpush3.bf16.msra.mxu1 %v399_v16 }
  0x16   :  { %404 = vmatprep.subr.bf16.mxu0 %v403_v19  ;;  %420 = vmatprep.subr.bf16.mxu1 %v403_v19 }
  0x19   :  { %406 = vmatpush3.bf16.msra.mxu0 %v403_v19  ;;  %428 = vmatpush3.bf16.msra.mxu1 %v403_v19 }
  0x1a   :  { %408 = vmatprep.subr.bf16.mxu0 %v407_v22  ;;  %421 = vmatprep.subr.bf16.mxu1 %v407_v22 }
  0x1d   :  { %410 = vmatpush3.bf16.msra.mxu0 %v407_v22  ;;  %429 = vmatpush3.bf16.msra.mxu1 %v407_v22 }
  0x1e   :  { %412 = vmatprep.subr.bf16.mxu0 %v411_v25  ;;  %422 = vmatprep.subr.bf16.mxu1 %v411_v25 }
  0x21   :  { %414 = vmatpush3.bf16.msra.mxu0 %v411_v25  ;;  %430 = vmatpush3.bf16.msra.mxu1 %v411_v25 }
  0x24   :  { %360 = vmatmul.mubr.f32.vlgmr.msra.gmra.mrb[0].mxu0 %v48_v26  ;;  %372 = vmatmul.mubr.f32.vlgmr.msra.gmra.mrb[0].mxu1 %v56_v27 }
  0x25   :  { %362 = vmatprep.mubr.f32.mxu0 %v49_v28  ;;  %374 = vmatprep.mubr.f32.mxu1 %v57_v29 }
  0x28   :  { %363 = vmatmul.mubr.f32.gmra.mrb[2].mxu0 %v50_v30  ;;  %375 = vmatmul.mubr.f32.gmra.mrb[2].mxu1 %v58_v31 }
  0x29   :  { %365 = vmatprep.mubr.f32.mxu0 %v51_v32  ;;  %377 = vmatprep.mubr.f32.mxu1 %v59_v33 }
  0x2c   :  { %366 = vmatmul.mubr.f32.gmra.mrb[4].mxu0 %v52_v34  ;;  %378 = vmatmul.mubr.f32.gmra.mrb[4].mxu1 %v60_v35 }
  0x2d   :  { %368 = vmatprep.mubr.f32.mxu0 %v53_v36  ;;  %380 = vmatprep.mubr.f32.mxu1 %v61_v37 }
  0x30   :  { %369 = vmatmul.mubr.f32.gmra.mrb[6].mxu0 %v54_v38  ;;  %381 = vmatmul.mubr.f32.gmra.mrb[6].mxu1 %v62_v39 }
  0xf7   :  { %v361_v40 = vpop.f32.mrb[0].mxu0  ;;  %v373_v41 = vpop.f32.mrb[0].mxu1 }
  0xf8   :  { %276 = vst [vmem:[%s592_s2 + $0x8] sm:$0xff] %v361_v40  ;;  %284 = vst [vmem:[%s592_s2 + $0x48] sm:$0xff] %v373_v41  ;;  %v145_v42 = vpop.f32.mrb[1].mxu0  ;;  %v185_v43 = vpop.f32.mrb[1].mxu1 }
  0xf9   :  { %275 = vst [vmem:[%s592_s2] sm:$0xff] %v145_v42  ;;  %283 = vst [vmem:[%s592_s2 + $0x40] sm:$0xff] %v185_v43 }
  0xfb   :  { %v364_v44 = vpop.f32.mrb[2].mxu0  ;;  %v376_v45 = vpop.f32.mrb[2].mxu1 }
  0xfc   :  { %278 = vst [vmem:[%s592_s2 + $0x18] sm:$0xff] %v364_v44  ;;  %286 = vst [vmem:[%s592_s2 + $0x58] sm:$0xff] %v376_v45  ;;  %v155_v46 = vpop.f32.mrb[3].mxu0  ;;  %v195_v47 = vpop.f32.mrb[3].mxu1 }
  0xfd   :  { %277 = vst [vmem:[%s592_s2 + $0x10] sm:$0xff] %v155_v46  ;;  %285 = vst [vmem:[%s592_s2 + $0x50] sm:$0xff] %v195_v47 }
  0xff   :  { %v367_v48 = vpop.f32.mrb[4].mxu0  ;;  %v379_v49 = vpop.f32.mrb[4].mxu1 }
 0x100   :  { %280 = vst [vmem:[%s592_s2 + $0x28] sm:$0xff] %v367_v48  ;;  %288 = vst [vmem:[%s592_s2 + $0x68] sm:$0xff] %v379_v49  ;;  %v165_v50 = vpop.f32.mrb[5].mxu0  ;;  %v205_v51 = vpop.f32.mrb[5].mxu1 }
 0x101   :  { %279 = vst [vmem:[%s592_s2 + $0x20] sm:$0xff] %v165_v50  ;;  %287 = vst [vmem:[%s592_s2 + $0x60] sm:$0xff] %v205_v51 }
 0x103   :  { %v370_v52 = vpop.f32.mrb[6].mxu0  ;;  %v382_v53 = vpop.f32.mrb[6].mxu1 }
 0x104   :  { %282 = vst [vmem:[%s592_s2 + $0x38] sm:$0xff] %v370_v52  ;;  %290 = vst [vmem:[%s592_s2 + $0x78] sm:$0xff] %v382_v53  ;;  %v175_v54 = vpop.f32.mrb[7].mxu0  ;;  %v215_v55 = vpop.f32.mrb[7].mxu1 }
 0x105   :  { %281 = vst [vmem:[%s592_s2 + $0x30] sm:$0xff] %v175_v54  ;;  %289 = vst [vmem:[%s592_s2 + $0x70] sm:$0xff] %v215_v55 }

// kernel: _cmg_core.7
= control target key start
LH: loop header
LB: loop body
LE: loop exit
PB: predicated region body
PF: predicated region fallthrough
CT: control target
= control target key end

     0   :  { %v392_v0 = vmov 0   ;;  %v186_v61 = vlaneseq  ;;  %s691_s1 = inlined_call_operand.vmem [shape: f32[128,1], index: 1, kind: input, shape index: {}]   ;;  %s692_s3 = inlined_call_operand.vmem [shape: f32[128,1], index: 3, kind: input, shape index: {}]   ;;  %s693_s0 = inlined_call_operand.vmem [shape: f32[128,128], index: 0, kind: input, shape index: {}]   ;;  %s694_s2 = inlined_call_operand.vmem [shape: f32[1,128], index: 2, kind: input, shape index: {}]   ;;  %s695_s4 = inlined_call_operand.vmem [shape: f32[128,128], index: 4, kind: output, shape index: {}]  }
   0x1   :  { %391 = vset.pattern.permute.xlu1 %v392_v0  ;;  %390 = vset.pattern.permute.xlu0 %v392_v0  ;;  %v19_v1 = vld [vmem:[%s691_s1 + $0x10] sm:$0xff]  ;;  %v17_v2 = vld [vmem:[%s691_s1] sm:$0xff]  ;;  %v20_v3 = vld [vmem:[%s691_s1 + $0x18] sm:$0xff] }
   0x2   :  { %v35_v4 = vmul.f32 0.5, %v19_v1  ;;  %v33_v5 = vmul.f32 0.5, %v17_v2  ;;  %v18_v6 = vld [vmem:[%s691_s1 + $0x8] sm:$0xff]  ;;  %v36_v7 = vmul.f32 0.5, %v20_v3  ;;  %v21_v10 = vld [vmem:[%s691_s1 + $0x20] sm:$0xff]  ;;  %v24_v13 = vld [vmem:[%s691_s1 + $0x38] sm:$0xff] }
   0x3   :  { %v34_v8 = vmul.f32 0.5, %v18_v6  ;;  %v22_v9 = vld [vmem:[%s691_s1 + $0x28] sm:$0xff]  ;;  %v37_v12 = vmul.f32 0.5, %v21_v10  ;;  %v23_v14 = vld [vmem:[%s691_s1 + $0x30] sm:$0xff]  ;;  %v40_v15 = vmul.f32 0.5, %v24_v13  ;;  %v25_v18 = vld [vmem:[%s691_s1 + $0x40] sm:$0xff] }
   0x4   :  { %77 = vperm.xlu1 %391, %v35_v4   ;;  %67 = vperm.xlu0 %390, %v33_v5   ;;  %v38_v11 = vmul.f32 0.5, %v22_v9  ;;  %v39_v16 = vmul.f32 0.5, %v23_v14  ;;  %v26_v17 = vld [vmem:[%s691_s1 + $0x48] sm:$0xff]  ;;  %v41_v20 = vmul.f32 0.5, %v25_v18  ;;  %v28_v21 = vld [vmem:[%s691_s1 + $0x58] sm:$0xff]  ;;  %v27_v22 = vld [vmem:[%s691_s1 + $0x50] sm:$0xff] }
   0x5   :  { %v42_v19 = vmul.f32 0.5, %v26_v17  ;;  %v44_v23 = vmul.f32 0.5, %v28_v21  ;;  %v43_v24 = vmul.f32 0.5, %v27_v22  ;;  %v30_v25 = vld [vmem:[%s691_s1 + $0x68] sm:$0xff]  ;;  %v29_v26 = vld [vmem:[%s691_s1 + $0x60] sm:$0xff]  ;;  %v32_v29 = vld [vmem:[%s691_s1 + $0x78] sm:$0xff] }
   0x6   :  { %v46_v27 = vmul.f32 0.5, %v30_v25  ;;  %v45_v28 = vmul.f32 0.5, %v29_v26  ;;  %v31_v30 = vld [vmem:[%s691_s1 + $0x70] sm:$0xff]  ;;  %v48_v31 = vmul.f32 0.5, %v32_v29  ;;  %v241_v33 = vld [vmem:[%s692_s3 + $0x8] sm:$0xff]  ;;  %v240_v34 = vld [vmem:[%s692_s3] sm:$0xff] }
   0x7   :  { %v47_v32 = vmul.f32 0.5, %v31_v30  ;;  %v243_v35 = vld [vmem:[%s692_s3 + $0x18] sm:$0xff]  ;;  %v242_v36 = vld [vmem:[%s692_s3 + $0x10] sm:$0xff]  ;;  %v245_v37 = vld [vmem:[%s692_s3 + $0x28] sm:$0xff]  ;;  %v532_v2 = vshrl.u32 %v186_v61, 7 }
   0x8   :  { %82 = vperm.xlu1 %391, %v36_v7   ;;  %72 = vperm.xlu0 %390, %v34_v8   ;;  %v244_v38 = vld [vmem:[%s692_s3 + $0x20] sm:$0xff]  ;;  %v247_v39 = vld [vmem:[%s692_s3 + $0x38] sm:$0xff]  ;;  %v246_v40 = vld [vmem:[%s692_s3 + $0x30] sm:$0xff] }
   0x9   :  { %v249_v41 = vld [vmem:[%s692_s3 + $0x48] sm:$0xff]  ;;  %v248_v42 = vld [vmem:[%s692_s3 + $0x40] sm:$0xff]  ;;  %v251_v43 = vld [vmem:[%s692_s3 + $0x58] sm:$0xff]  ;;  %v188_v10 = vadd.s32 8, %v532_v2  ;;  %v189_v21 = vadd.s32 16, %v532_v2 }
   0xa   :  { %v250_v44 = vld [vmem:[%s692_s3 + $0x50] sm:$0xff]  ;;  %v253_v45 = vld [vmem:[%s692_s3 + $0x68] sm:$0xff]  ;;  %v252_v46 = vld [vmem:[%s692_s3 + $0x60] sm:$0xff] }
   0xb   :  { %v255_v47 = vld [vmem:[%s692_s3 + $0x78] sm:$0xff]  ;;  %v254_v48 = vld [vmem:[%s692_s3 + $0x70] sm:$0xff]  ;;  %v49_v62 = vld [vmem:[%s693_s0] sm:$0xff] }
   0xc   :  { %92 = vperm.xlu1 %391, %v38_v11   ;;  %87 = vperm.xlu0 %390, %v37_v12   ;;  %v50_v63 = vld [vmem:[%s693_s0 + $0x8] sm:$0xff]  ;;  %v51_v5 = vld [vmem:[%s693_s0 + $0x10] sm:$0xff]  ;;  %v52_v6 = vld [vmem:[%s693_s0 + $0x18] sm:$0xff]  ;;  %v550_v11 = vand.u32 127, %v186_v61 }
   0xd   :  { %v547_v9 = vld [vmem:[%s694_s2] ss:$0 sm:$0xff]  ;;  %v54_v14 = vld [vmem:[%s693_s0 + $0x28] sm:$0xff]  ;;  %v56_v30 = vld [vmem:[%s693_s0 + $0x38] sm:$0xff] }
   0xe   :  { %vm225_vm0 = vcmp.eq.s32.totalorder %v188_v10, %v550_v11  ;;  %vm224_vm1 = vcmp.eq.s32.totalorder %v532_v2, %v550_v11  ;;  %vm226_vm3 = vcmp.eq.s32.totalorder %v189_v21, %v550_v11 }
  0x10   :  { %102 = vperm.xlu1 %391, %v40_v15   ;;  %97 = vperm.xlu0 %390, %v39_v16   ;;  %v53_v15 = vld [vmem:[%s693_s0 + $0x20] sm:$0xff] }
  0x14   :  { %112 = vperm.xlu1 %391, %v42_v19   ;;  %107 = vperm.xlu0 %390, %v41_v20   ;;  %v190_v20 = vadd.s32 24, %v532_v2 }
  0x16   :  { %vm227_vm2 = vcmp.eq.s32.totalorder %v190_v20, %v550_v11  ;;  %v197_v20 = vadd.s32 80, %v532_v2 }
  0x18   :  { %122 = vperm.xlu1 %391, %v44_v23   ;;  %117 = vperm.xlu0 %390, %v43_v24   ;;  %vm234_vm11 = vcmp.eq.s32.totalorder %v197_v20, %v550_v11 }
  0x1c   :  { %132 = vperm.xlu1 %391, %v46_v27   ;;  %127 = vperm.xlu0 %390, %v45_v28  }
  0x20   :  { %142 = vperm.xlu1 %391, %v48_v31   ;;  %137 = vperm.xlu0 %390, %v47_v32   ;;  %v55_v31 = vld [vmem:[%s693_s0 + $0x30] sm:$0xff] }
  0x24   :  { %263 = vperm.xlu1 %391, %v241_v33   ;;  %258 = vperm.xlu0 %390, %v240_v34   ;;  %v192_v34 = vadd.s32 40, %v532_v2 }
  0x26   :  { %vm229_vm4 = vcmp.eq.s32.totalorder %v192_v34, %v550_v11 }
  0x28   :  { %273 = vperm.xlu1 %391, %v243_v35   ;;  %268 = vperm.xlu0 %390, %v242_v36   ;;  %v191_v35 = vadd.s32 32, %v532_v2 }
  0x2a   :  { %vm228_vm5 = vcmp.eq.s32.totalorder %v191_v35, %v550_v11 }
  0x2c   :  { %283 = vperm.xlu1 %391, %v245_v37   ;;  %278 = vperm.xlu0 %390, %v244_v38  }
  0x30   :  { %293 = vperm.xlu1 %391, %v247_v39   ;;  %288 = vperm.xlu0 %390, %v246_v40  }
  0x34   :  { %303 = vperm.xlu1 %391, %v249_v41   ;;  %298 = vperm.xlu0 %390, %v248_v42   ;;  %v58_v42 = vld [vmem:[%s693_s0 + $0x48] sm:$0xff] }
  0x38   :  { %313 = vperm.xlu1 %391, %v251_v43   ;;  %308 = vperm.xlu0 %390, %v250_v44   ;;  %v57_v43 = vld [vmem:[%s693_s0 + $0x40] sm:$0xff] }
  0x3c   :  { %323 = vperm.xlu1 %391, %v253_v45   ;;  %318 = vperm.xlu0 %390, %v252_v46  }
  0x40   :  { %333 = vperm.xlu1 %391, %v255_v47   ;;  %328 = vperm.xlu0 %390, %v254_v48   ;;  %v194_v48 = vadd.s32 56, %v532_v2 }
  0x42   :  { %vm231_vm6 = vcmp.eq.s32.totalorder %v194_v48, %v550_v11 }
  0x83   :  { %v78_v49 = vpop.permute.xlu1 %77  ;;  %v68_v50 = vpop.permute.xlu0 %67 }
  0x84   :  { %v145_v3 = vmul.f32 %v68_v50, %v49_v62  ;;  %v147_v12 = vmul.f32 %v78_v49, %v51_v5  ;;  %v193_v49 = vadd.s32 48, %v532_v2  ;;  %v60_v62 = vld [vmem:[%s693_s0 + $0x58] sm:$0xff] }
  0x86   :  { %v168_v17 = vmul.f32 %v547_v9, %v145_v3  ;;  %v170_v29 = vmul.f32 %v547_v9, %v147_v12  ;;  %vm230_vm7 = vcmp.eq.s32.totalorder %v193_v49, %v550_v11  ;;  %v196_v3 = vadd.s32 72, %v532_v2 }
  0x87   :  { %v83_v51 = vpop.permute.xlu1 %82  ;;  %v73_v52 = vpop.permute.xlu0 %72 }
  0x88   :  { %v146_v4 = vmul.f32 %v73_v52, %v50_v63  ;;  %v148_v13 = vmul.f32 %v83_v51, %v52_v6  ;;  %v59_v63 = vld [vmem:[%s693_s0 + $0x50] sm:$0xff]  ;;  %vm233_vm8 = vcmp.eq.s32.totalorder %v196_v3, %v550_v11 }
  0x8a   :  { %v169_v16 = vmul.f32 %v547_v9, %v146_v4  ;;  %v171_v28 = vmul.f32 %v547_v9, %v148_v13  ;;  %v195_v4 = vadd.s32 64, %v532_v2 }
  0x8b   :  { %v93_v53 = vpop.permute.xlu1 %92  ;;  %v88_v54 = vpop.permute.xlu0 %87 }
  0x8c   :  { %v150_v24 = vmul.f32 %v93_v53, %v54_v14  ;;  %v149_v25 = vmul.f32 %v88_v54, %v53_v15  ;;  %v62_v15 = vld [vmem:[%s693_s0 + $0x68] sm:$0xff]  ;;  %vm232_vm9 = vcmp.eq.s32.totalorder %v195_v4, %v550_v11 }
  0x8e   :  { %v173_v38 = vmul.f32 %v547_v9, %v150_v24  ;;  %v172_v39 = vmul.f32 %v547_v9, %v149_v25 }
  0x8f   :  { %v103_v55 = vpop.permute.xlu1 %102  ;;  %v98_v56 = vpop.permute.xlu0 %97 }
  0x90   :  { %v152_v40 = vmul.f32 %v103_v55, %v56_v30  ;;  %v151_v41 = vmul.f32 %v98_v56, %v55_v31  ;;  %v63_v30 = vld [vmem:[%s693_s0 + $0x70] sm:$0xff]  ;;  %v200_v31 = vadd.s32 104, %v532_v2 }
  0x92   :  { %v175_v56 = vmul.f32 %v547_v9, %v152_v40  ;;  %v174_v61 = vmul.f32 %v547_v9, %v151_v41  ;;  %vm237_vm12 = vcmp.eq.s32.totalorder %v200_v31, %v550_v11 }
  0x93   :  { %v514_v57 = vpop.permute.xlu1 %112  ;;  %v516_v58 = vpop.permute.xlu0 %107 }
  0x94   :  { %v154_v52 = vmul.f32 %v514_v57, %v58_v42  ;;  %v153_v53 = vmul.f32 %v516_v58, %v57_v43 }
  0x96   :  { %v177_v10 = vmul.f32 %v547_v9, %v154_v52  ;;  %v176_v12 = vmul.f32 %v547_v9, %v153_v53 }
  0x97   :  { %v518_v59 = vpop.permute.xlu1 %122  ;;  %v520_v60 = vpop.permute.xlu0 %117 }
  0x98   :  { %v156_v13 = vmul.f32 %v518_v59, %v60_v62  ;;  %v155_v14 = vmul.f32 %v520_v60, %v59_v63 }
  0x9b   :  { %v528_v0 = vpop.permute.xlu1 %132  ;;  %v530_v1 = vpop.permute.xlu0 %127 }
  0x9f   :  { %v540_v7 = vpop.permute.xlu1 %142  ;;  %v542_v8 = vpop.permute.xlu0 %137 }
  0xa3   :  { %v264_v18 = vpop.permute.xlu1 %263  ;;  %v259_v19 = vpop.permute.xlu0 %258 }
  0xa4   :  { %v337_v22 = vadd.f32 %v264_v18, %v169_v16  ;;  %v336_v23 = vadd.f32 %v259_v19, %v168_v17  ;;  %v198_v19 = vadd.s32 88, %v532_v2 }
  0xa6   :  { %v353_v26 = vsel %vm225_vm0, %v337_v22, %v169_v16  ;;  %v352_v27 = vsel %vm224_vm1, %v336_v23, %v168_v17  ;;  %v61_v16 = vld [vmem:[%s693_s0 + $0x60] sm:$0xff]  ;;  %v158_v23 = vmul.f32 %v528_v0, %v62_v15  ;;  %vm235_vm10 = vcmp.eq.s32.totalorder %v198_v19, %v550_v11 }
  0xa7   :  { %369 = vst [vmem:[%s695_s4 + $0x8] sm:$0xff] %v353_v26  ;;  %368 = vst [vmem:[%s695_s4] sm:$0xff] %v352_v27  ;;  %v274_v32 = vpop.permute.xlu1 %273  ;;  %v269_v33 = vpop.permute.xlu0 %268  ;;  %v157_v24 = vmul.f32 %v530_v1, %v61_v16  ;;  %v179_v27 = vmul.f32 %v547_v9, %v156_v13 }
  0xa8   :  { %v339_v36 = vadd.f32 %v274_v32, %v171_v28  ;;  %v338_v37 = vadd.f32 %v269_v33, %v170_v29  ;;  %v199_v32 = vadd.s32 96, %v532_v2  ;;  %v181_v35 = vmul.f32 %v547_v9, %v158_v23 }
  0xaa   :  { %v355_v44 = vsel %vm227_vm2, %v339_v36, %v171_v28  ;;  %v354_v45 = vsel %vm226_vm3, %v338_v37, %v170_v29  ;;  %v178_v28 = vmul.f32 %v547_v9, %v155_v14  ;;  %v64_v29 = vld [vmem:[%s693_s0 + $0x78] sm:$0xff]  ;;  %v180_v36 = vmul.f32 %v547_v9, %v157_v24 }
  0xab   :  { %371 = vst [vmem:[%s695_s4 + $0x18] sm:$0xff] %v355_v44  ;;  %370 = vst [vmem:[%s695_s4 + $0x10] sm:$0xff] %v354_v45  ;;  %v284_v46 = vpop.permute.xlu1 %283  ;;  %v279_v47 = vpop.permute.xlu0 %278  ;;  %v160_v37 = vmul.f32 %v540_v7, %v64_v29  ;;  %vm236_vm13 = vcmp.eq.s32.totalorder %v199_v32, %v550_v11  ;;  %v202_v7 = vadd.s32 120, %v532_v2 }
  0xac   :  { %v341_v50 = vadd.f32 %v284_v46, %v173_v38  ;;  %v340_v51 = vadd.f32 %v279_v47, %v172_v39 }
  0xad   :  { %v183_v47 = vmul.f32 %v547_v9, %v160_v37  ;;  %vm239_vm14 = vcmp.eq.s32.totalorder %v202_v7, %v550_v11 }
  0xae   :  { %v357_v54 = vsel %vm229_vm4, %v341_v50, %v173_v38  ;;  %v356_v55 = vsel %vm228_vm5, %v340_v51, %v172_v39  ;;  %v159_v38 = vmul.f32 %v542_v8, %v63_v30  ;;  %v201_v8 = vadd.s32 112, %v532_v2 }
  0xaf   :  { %373 = vst [vmem:[%s695_s4 + $0x28] sm:$0xff] %v357_v54  ;;  %372 = vst [vmem:[%s695_s4 + $0x20] sm:$0xff] %v356_v55  ;;  %v294_v57 = vpop.permute.xlu1 %293  ;;  %v289_v58 = vpop.permute.xlu0 %288 }
  0xb0   :  { %v343_v5 = vadd.f32 %v294_v57, %v175_v56  ;;  %v342_v6 = vadd.f32 %v289_v58, %v174_v61  ;;  %v182_v48 = vmul.f32 %v547_v9, %v159_v38  ;;  %vm238_vm15 = vcmp.eq.s32.totalorder %v201_v8, %v550_v11 }
  0xb2   :  { %v359_v17 = vsel %vm231_vm6, %v343_v5, %v175_v56  ;;  %v358_v18 = vsel %vm230_vm7, %v342_v6, %v174_v61 }
  0xb3   :  { %375 = vst [vmem:[%s695_s4 + $0x38] sm:$0xff] %v359_v17  ;;  %374 = vst [vmem:[%s695_s4 + $0x30] sm:$0xff] %v358_v18  ;;  %v304_v59 = vpop.permute.xlu1 %303  ;;  %v299_v60 = vpop.permute.xlu0 %298 }
  0xb4   :  { %v345_v21 = vadd.f32 %v304_v59, %v177_v10  ;;  %v344_v22 = vadd.f32 %v299_v60, %v176_v12 }
  0xb6   :  { %v361_v25 = vsel %vm233_vm8, %v345_v21, %v177_v10  ;;  %v360_v26 = vsel %vm232_vm9, %v344_v22, %v176_v12 }
  0xb7   :  { %377 = vst [vmem:[%s695_s4 + $0x48] sm:$0xff] %v361_v25  ;;  %376 = vst [vmem:[%s695_s4 + $0x40] sm:$0xff] %v360_v26  ;;  %v314_v0 = vpop.permute.xlu1 %313  ;;  %v309_v1 = vpop.permute.xlu0 %308 }
  0xb8   :  { %v347_v33 = vadd.f32 %v314_v0, %v179_v27  ;;  %v346_v34 = vadd.f32 %v309_v1, %v178_v28 }
  0xba   :  { %v363_v39 = vsel %vm235_vm10, %v347_v33, %v179_v27  ;;  %v362_v40 = vsel %vm234_vm11, %v346_v34, %v178_v28 }
  0xbb   :  { %379 = vst [vmem:[%s695_s4 + $0x58] sm:$0xff] %v363_v39  ;;  %378 = vst [vmem:[%s695_s4 + $0x50] sm:$0xff] %v362_v40  ;;  %v324_v41 = vpop.permute.xlu1 %323  ;;  %v319_v42 = vpop.permute.xlu0 %318 }
  0xbc   :  { %v349_v43 = vadd.f32 %v324_v41, %v181_v35  ;;  %v348_v44 = vadd.f32 %v319_v42, %v180_v36 }
  0xbe   :  { %v365_v45 = vsel %vm237_vm12, %v349_v43, %v181_v35  ;;  %v364_v46 = vsel %vm236_vm13, %v348_v44, %v180_v36 }
  0xbf   :  { %381 = vst [vmem:[%s695_s4 + $0x68] sm:$0xff] %v365_v45  ;;  %380 = vst [vmem:[%s695_s4 + $0x60] sm:$0xff] %v364_v46  ;;  %v334_v49 = vpop.permute.xlu1 %333  ;;  %v329_v2 = vpop.permute.xlu0 %328 }
  0xc0   :  { %v351_v50 = vadd.f32 %v334_v49, %v183_v47  ;;  %v350_v51 = vadd.f32 %v329_v2, %v182_v48 }
  0xc2   :  { %v367_v52 = vsel %vm239_vm14, %v351_v50, %v183_v47  ;;  %v366_v53 = vsel %vm238_vm15, %v350_v51, %v182_v48 }
  0xc3   :  { %383 = vst [vmem:[%s695_s4 + $0x78] sm:$0xff] %v367_v52  ;;  %382 = vst [vmem:[%s695_s4 + $0x70] sm:$0xff] %v366_v53 }

// kernel: _cmg_core.11
= control target key start
LH: loop header
LB: loop body
LE: loop exit
PB: predicated region body
PF: predicated region fallthrough
CT: control target
= control target key end

     0   :  { %vm1161_vm0 = vcmask 7168   ;;  %v588_v40 = vmov 0.0   ;;  %v1225_v53 = vmov 0  ;;  %s1156_s1 = inlined_call_operand.vmem [shape: f32[128,128], index: 1, kind: input, shape index: {}, may-alias: {0,1}]   ;;  %s1157_s0 = inlined_call_operand.vmem [shape: f32[128,128], index: 0, kind: input, shape index: {}, may-alias: {0,1}]   ;;  %s1158_s4 = inlined_call_operand.vmem [shape: f32[128,1], index: 4, kind: output, shape index: {1}]   ;;  %s1159_s2 = inlined_call_operand.vmem [shape: s8[128,128], index: 2, kind: input, shape index: {}]   ;;  %s1160_s3 = inlined_call_operand.vmem [shape: f32[128,128], index: 3, kind: output, shape index: {0}]  }
   0x1   :  { %v53_v0 = vld [vmem:[%s1156_s1] sm:$0xff]  ;;  %v54_v1 = vld [vmem:[%s1156_s1 + $0x8] sm:$0xff]  ;;  %v55_v2 = vld [vmem:[%s1156_s1 + $0x10] sm:$0xff]  ;;  %30 = vst.msk [vmem:[%s1158_s4 + $0x48] sm:$0xff] %vm1161_vm0, %v588_v40 }
   0x2   :  { %v539_v3 = vpack.c.bf16 %v54_v1, %v53_v0  ;;  %v56_v4 = vld [vmem:[%s1156_s1 + $0x18] sm:$0xff]  ;;  %v37_v6 = vld [vmem:[%s1157_s0] sm:$0xff]  ;;  %v58_v9 = vld [vmem:[%s1156_s1 + $0x28] sm:$0xff]  ;;  %21 = vst.msk [vmem:[%s1158_s4] sm:$0xff] %vm1161_vm0, %v588_v40  ;;  %v1178_v0 = vmov 0  ;;  %v1180_v1 = vmov 0 }
   0x3   :  { %v543_v5 = vpack.c.bf16 %v56_v4, %v55_v2  ;;  %v45_v7 = vld [vmem:[%s1157_s0 + $0x40] sm:$0xff]  ;;  %515 = vmatprep.mubr.f32.mxu0 %v37_v6  ;;  %v59_v11 = vld [vmem:[%s1156_s1 + $0x30] sm:$0xff]  ;;  %v60_v12 = vld [vmem:[%s1156_s1 + $0x38] sm:$0xff]  ;;  %22 = vst.msk [vmem:[%s1158_s4 + $0x8] sm:$0xff] %vm1161_vm0, %v588_v40  ;;  %v1182_v2 = vmov 0  ;;  %v1184_v4 = vmov 0 }
   0x4   :  { %540 = vmatprep.subr.bf16.mxu0 %v539_v3  ;;  %571 = vmatprep.subr.bf16.mxu1 %v539_v3  ;;  %v57_v8 = vld [vmem:[%s1156_s1 + $0x20] sm:$0xff]  ;;  %v551_v13 = vpack.c.bf16 %v60_v12, %v59_v11  ;;  %v62_v15 = vld [vmem:[%s1156_s1 + $0x48] sm:$0xff]  ;;  %v63_v17 = vld [vmem:[%s1156_s1 + $0x50] sm:$0xff]  ;;  %23 = vst.msk [vmem:[%s1158_s4 + $0x10] sm:$0xff] %vm1161_vm0, %v588_v40  ;;  %v1188_v6 = vmov 0  ;;  %v1194_v11 = vmov 0 }
   0x5   :  { %542 = vmatpush3.bf16.xpose.msra.mxu0 %v539_v3  ;;  %579 = vmatpush3.bf16.xpose.msra.mxu1 %v539_v3  ;;  %v547_v10 = vpack.c.bf16 %v58_v9, %v57_v8  ;;  %v61_v14 = vld [vmem:[%s1156_s1 + $0x40] sm:$0xff]  ;;  %v64_v18 = vld [vmem:[%s1156_s1 + $0x58] sm:$0xff]  ;;  %v66_v21 = vld [vmem:[%s1156_s1 + $0x68] sm:$0xff]  ;;  %24 = vst.msk [vmem:[%s1158_s4 + $0x18] sm:$0xff] %vm1161_vm0, %v588_v40  ;;  %v1192_v8 = vmov 0  ;;  %v1196_v12 = vmov 0 }
   0x6   :  { %544 = vmatprep.subr.bf16.mxu0 %v543_v5  ;;  %572 = vmatprep.subr.bf16.mxu1 %v543_v5  ;;  %v555_v16 = vpack.c.bf16 %v62_v15, %v61_v14  ;;  %v559_v19 = vpack.c.bf16 %v64_v18, %v63_v17  ;;  %v65_v20 = vld [vmem:[%s1156_s1 + $0x60] sm:$0xff]  ;;  %v67_v23 = vld [vmem:[%s1156_s1 + $0x70] sm:$0xff]  ;;  %v68_v24 = vld [vmem:[%s1156_s1 + $0x78] sm:$0xff]  ;;  %25 = vst.msk [vmem:[%s1158_s4 + $0x20] sm:$0xff] %vm1161_vm0, %v588_v40 }
   0x7   :  { %527 = vmatprep.mubr.f32.mxu1 %v45_v7  ;;  %v563_v22 = vpack.c.bf16 %v66_v21, %v65_v20  ;;  %v567_v25 = vpack.c.bf16 %v68_v24, %v67_v23  ;;  %v38_v26 = vld [vmem:[%s1157_s0 + $0x8] sm:$0xff]  ;;  %v39_v28 = vld [vmem:[%s1157_s0 + $0x10] sm:$0xff]  ;;  %v40_v30 = vld [vmem:[%s1157_s0 + $0x18] sm:$0xff]  ;;  %26 = vst.msk [vmem:[%s1158_s4 + $0x28] sm:$0xff] %vm1161_vm0, %v588_v40  ;;  %v1190_v7 = vmov 0  ;;  %v1202_v21 = vmov 0 }
   0x8   :  { %v46_v27 = vld [vmem:[%s1157_s0 + $0x48] sm:$0xff]  ;;  %v47_v29 = vld [vmem:[%s1157_s0 + $0x50] sm:$0xff]  ;;  %v48_v31 = vld [vmem:[%s1157_s0 + $0x58] sm:$0xff]  ;;  %27 = vst.msk [vmem:[%s1158_s4 + $0x30] sm:$0xff] %vm1161_vm0, %v588_v40 }
   0x9   :  { %v41_v32 = vld [vmem:[%s1157_s0 + $0x20] sm:$0xff]  ;;  %v42_v34 = vld [vmem:[%s1157_s0 + $0x28] sm:$0xff]  ;;  %v43_v36 = vld [vmem:[%s1157_s0 + $0x30] sm:$0xff]  ;;  %28 = vst.msk [vmem:[%s1158_s4 + $0x38] sm:$0xff] %vm1161_vm0, %v588_v40 }
   0xa   :  { %v49_v33 = vld [vmem:[%s1157_s0 + $0x60] sm:$0xff]  ;;  %v50_v35 = vld [vmem:[%s1157_s0 + $0x68] sm:$0xff]  ;;  %v51_v37 = vld [vmem:[%s1157_s0 + $0x70] sm:$0xff]  ;;  %29 = vst.msk [vmem:[%s1158_s4 + $0x40] sm:$0xff] %vm1161_vm0, %v588_v40 }
   0xb   :  { %v44_v38 = vld [vmem:[%s1157_s0 + $0x38] sm:$0xff]  ;;  %31 = vst.msk [vmem:[%s1158_s4 + $0x50] sm:$0xff] %vm1161_vm0, %v588_v40  ;;  %32 = vst.msk [vmem:[%s1158_s4 + $0x58] sm:$0xff] %vm1161_vm0, %v588_v40  ;;  %v216_v41 = vld [vmem:[%s1159_s2 + $0x10] sm:$0xff] }
   0xc   :  { %v52_v39 = vld [vmem:[%s1157_s0 + $0x78] sm:$0xff]  ;;  %33 = vst.msk [vmem:[%s1158_s4 + $0x60] sm:$0xff] %vm1161_vm0, %v588_v40  ;;  %34 = vst.msk [vmem:[%s1158_s4 + $0x68] sm:$0xff] %vm1161_vm0, %v588_v40  ;;  %v214_v42 = vld [vmem:[%s1159_s2] sm:$0xff]  ;;  %v227_v43 = vunpack.c.1.s8 %v216_v41  ;;  %v226_v46 = vunpack.c.0.s8 %v216_v41  ;;  %v229_v54 = vunpack.c.3.s8 %v216_v41  ;;  %v228_v55 = vunpack.c.2.s8 %v216_v41 }
   0xd   :  { %546 = vmatpush3.bf16.xpose.msra.mxu0 %v543_v5  ;;  %580 = vmatpush3.bf16.xpose.msra.mxu1 %v543_v5  ;;  %35 = vst.msk [vmem:[%s1158_s4 + $0x70] sm:$0xff] %vm1161_vm0, %v588_v40  ;;  %36 = vst.msk [vmem:[%s1158_s4 + $0x78] sm:$0xff] %vm1161_vm0, %v588_v40  ;;  %v219_v44 = vunpack.c.1.s8 %v214_v42  ;;  %v218_v45 = vunpack.c.0.s8 %v214_v42  ;;  %v783_v47 = vld [vmem:[%s1159_s2 + $0x8] sm:$0xff]  ;;  %v221_v49 = vunpack.c.3.s8 %v214_v42  ;;  %v220_v50 = vunpack.c.2.s8 %v214_v42  ;;  %v792_v51 = vld [vmem:[%s1159_s2 + $0x18] sm:$0xff] }
   0xe   :  { %548 = vmatprep.subr.bf16.mxu0 %v547_v10  ;;  %573 = vmatprep.subr.bf16.mxu1 %v547_v10  ;;  %vm785_vm1 = vcmp.gt.s32.totalorder %v227_v43, 0  ;;  %vm794_vm2 = vcmp.eq.s32.totalorder %v227_v43, 3  ;;  %vm810_vm6 = vcmp.gt.s32.totalorder %v226_v46, 0  ;;  %v223_v59 = vunpack.c.1.s8 %v783_v47 }
   0xf   :  { %vm798_vm3 = vcmp.gt.s32.totalorder %v219_v44, 0  ;;  %vm802_vm4 = vcmp.eq.s32.totalorder %v219_v44, 3  ;;  %vm806_vm5 = vcmp.gt.s32.totalorder %v218_v45, 0  ;;  %vm815_vm7 = vcmp.eq.s32.totalorder %v218_v45, 3 }
  0x10   :  { %vm819_vm8 = vcmp.eq.s32.totalorder %v226_v46, 3  ;;  %v222_v62 = vunpack.c.0.s8 %v783_v47  ;;  %v231_v63 = vunpack.c.1.s8 %v792_v51  ;;  %vm825_vm9 = vcmp.gt.s32.totalorder %v221_v49, 0 }
  0x11   :  { %v1179_v0 = vsel %vm825_vm9, 4294967295, %v1178_v0  ;;  %vm829_vm10 = vcmp.eq.s32.totalorder %v221_v49, 3  ;;  %vm833_vm11 = vcmp.eq.s32.totalorder %v220_v50, 3  ;;  %v230_v3 = vunpack.c.0.s8 %v792_v51 }
  0x12   :  { %v1181_v1 = vsel %vm829_vm10, 4294967295, %v1180_v1  ;;  %v1183_v2 = vsel %vm833_vm11, 4294967295, %v1182_v2  ;;  %vm838_vm12 = vcmp.gt.s32.totalorder %v229_v54, 0  ;;  %vm842_vm13 = vcmp.eq.s32.totalorder %v229_v54, 3 }
  0x13   :  { %v1185_v4 = vsel %vm838_vm12, 4294967295, %v1184_v4  ;;  %v1186_v5 = vmov 0  ;;  %vm846_vm14 = vcmp.gt.s32.totalorder %v228_v55, 0  ;;  %vm850_vm15 = vcmp.eq.s32.totalorder %v228_v55, 3 }
  0x14   :  { %v1187_v5 = vsel %vm842_vm13, 4294967295, %v1186_v5  ;;  %v1189_v6 = vsel %vm846_vm14, 4294967295, %v1188_v6  ;;  %v1191_v7 = vsel %vm850_vm15, 4294967295, %v1190_v7  ;;  %vm854_vm0 = vcmp.gt.s32.totalorder %v220_v50, 0 }
  0x15   :  { %550 = vmatpush3.bf16.xpose.msra.mxu0 %v547_v10  ;;  %581 = vmatpush3.bf16.xpose.msra.mxu1 %v547_v10  ;;  %v1193_v8 = vsel %vm854_vm0, 4294967295, %v1192_v8  ;;  %vm858_vm11 = vcmp.gt.s32.totalorder %v223_v59, 0  ;;  %vm862_vm12 = vcmp.eq.s32.totalorder %v223_v59, 3  ;;  %v224_v14 = vunpack.c.2.s8 %v783_v47 }
  0x16   :  { %552 = vmatprep.subr.bf16.mxu0 %v551_v13  ;;  %574 = vmatprep.subr.bf16.mxu1 %v551_v13  ;;  %v1195_v11 = vsel %vm858_vm11, 4294967295, %v1194_v11  ;;  %v1197_v12 = vsel %vm862_vm12, 4294967295, %v1196_v12  ;;  %vm868_vm0 = vcmp.gt.s32.totalorder %v222_v62, 0  ;;  %vm872_vm15 = vcmp.eq.s32.totalorder %v222_v62, 3 }
  0x17   :  { %vm876_vm11 = vcmp.eq.s32.totalorder %v231_v63, 3  ;;  %vm883_vm10 = vcmp.gt.s32.totalorder %v231_v63, 0  ;;  %v1214_v44 = vmov 0  ;;  %v1216_v45 = vmov 0 }
  0x18   :  { %v1203_v21 = vsel %vm876_vm11, 4294967295, %v1202_v21  ;;  %v1218_v46 = vmov 0  ;;  %v1220_v50 = vmov 0 }
  0x1d   :  { %554 = vmatpush3.bf16.xpose.msra.mxu0 %v551_v13  ;;  %582 = vmatpush3.bf16.xpose.msra.mxu1 %v551_v13  ;;  %v225_v13 = vunpack.c.3.s8 %v783_v47 }
  0x1e   :  { %556 = vmatprep.subr.bf16.mxu0 %v555_v16  ;;  %575 = vmatprep.subr.bf16.mxu1 %v555_v16 }
  0x25   :  { %558 = vmatpush3.bf16.xpose.msra.mxu0 %v555_v16  ;;  %583 = vmatpush3.bf16.xpose.msra.mxu1 %v555_v16 }
  0x26   :  { %560 = vmatprep.subr.bf16.mxu0 %v559_v19  ;;  %576 = vmatprep.subr.bf16.mxu1 %v559_v19 }
  0x2d   :  { %562 = vmatpush3.bf16.xpose.msra.mxu0 %v559_v19  ;;  %584 = vmatpush3.bf16.xpose.msra.mxu1 %v559_v19  ;;  %v1198_v19 = vmov 0 }
  0x2e   :  { %564 = vmatprep.subr.bf16.mxu0 %v563_v22  ;;  %577 = vmatprep.subr.bf16.mxu1 %v563_v22  ;;  %v1199_v19 = vsel %vm868_vm0, 4294967295, %v1198_v19  ;;  %vm887_vm0 = vcmp.eq.s32.totalorder %v230_v3, 3 }
  0x35   :  { %566 = vmatpush3.bf16.xpose.msra.mxu0 %v563_v22  ;;  %585 = vmatpush3.bf16.xpose.msra.mxu1 %v563_v22  ;;  %v233_v22 = vunpack.c.3.s8 %v792_v51 }
  0x36   :  { %568 = vmatprep.subr.bf16.mxu0 %v567_v25  ;;  %578 = vmatprep.subr.bf16.mxu1 %v567_v25 }
  0x3d   :  { %570 = vmatpush3.bf16.xpose.msra.mxu0 %v567_v25  ;;  %586 = vmatpush3.bf16.xpose.msra.mxu1 %v567_v25 }
  0x44   :  { %516 = vmatmul.mubr.f32.vlgmr.msra.gmra.mrb[0].mxu0 %v38_v26  ;;  %528 = vmatmul.mubr.f32.vlgmr.msra.gmra.mrb[0].mxu1 %v46_v27 }
  0x45   :  { %518 = vmatprep.mubr.f32.mxu0 %v39_v28  ;;  %530 = vmatprep.mubr.f32.mxu1 %v47_v29  ;;  %v371_v29 = vld [vmem:[%s1158_s4 + $0x48] sm:$0xff] }
  0x48   :  { %519 = vmatmul.mubr.f32.gmra.mrb[2].mxu0 %v40_v30  ;;  %531 = vmatmul.mubr.f32.gmra.mrb[2].mxu1 %v48_v31  ;;  %v232_v30 = vunpack.c.2.s8 %v792_v51 }
  0x49   :  { %521 = vmatprep.mubr.f32.mxu0 %v41_v32  ;;  %533 = vmatprep.mubr.f32.mxu1 %v49_v33 }
  0x4c   :  { %522 = vmatmul.mubr.f32.gmra.mrb[4].mxu0 %v42_v34  ;;  %534 = vmatmul.mubr.f32.gmra.mrb[4].mxu1 %v50_v35 }
  0x4d   :  { %524 = vmatprep.mubr.f32.mxu0 %v43_v36  ;;  %536 = vmatprep.mubr.f32.mxu1 %v51_v37 }
  0x50   :  { %525 = vmatmul.mubr.f32.gmra.mrb[6].mxu0 %v44_v38  ;;  %537 = vmatmul.mubr.f32.gmra.mrb[6].mxu1 %v52_v39 }
 0x117   :  { %v517_v9 = vpop.f32.mrb[0].mxu0  ;;  %v529_v10 = vpop.f32.mrb[0].mxu1 }
 0x118   :  { %v283_v15 = vmax.f32 %v517_v9, 0.0  ;;  %v291_v16 = vmax.f32 %v529_v10, 0.0  ;;  %v135_v17 = vpop.f32.mrb[1].mxu0  ;;  %v175_v18 = vpop.f32.mrb[1].mxu1  ;;  %vm275_vm14 = vcmp.gt.f32.partialorder %v529_v10, 0.1 }
 0x119   :  { %v282_v23 = vmax.f32 %v135_v17, 0.0  ;;  %v290_v24 = vmax.f32 %v175_v18, 0.0  ;;  %vm323_vm12 = vmand %vm785_vm1, %vm275_vm14  ;;  %vm267_vm13 = vcmp.gt.f32.partialorder %v517_v9, 0.1  ;;  %vm266_vm9 = vcmp.gt.f32.partialorder %v135_v17, 0.1 }
 0x11a   :  { %v307_v27 = vsel %vm794_vm2, %v529_v10, %v291_v16  ;;  %v299_v28 = vsel %vm802_vm4, %v517_v9, %v283_v15  ;;  %vm315_vm11 = vmand %vm798_vm3, %vm267_vm13  ;;  %vm274_vm1 = vcmp.gt.f32.partialorder %v175_v18, 0.1  ;;  %vm897_vm14 = vcmp.gt.s32.totalorder %v230_v3, 0 }
 0x11b   :  { %v520_v31 = vpop.f32.mrb[2].mxu0  ;;  %v339_v32 = vsel %vm323_vm12, %v307_v27, 0.0  ;;  %v532_v33 = vpop.f32.mrb[2].mxu1  ;;  %v331_v34 = vsel %vm315_vm11, %v299_v28, 0.0  ;;  %v298_v35 = vsel %vm815_vm7, %v135_v17, %v282_v23  ;;  %vm314_vm2 = vmand %vm806_vm5, %vm266_vm9  ;;  %v306_v36 = vsel %vm819_vm8, %v175_v18, %v290_v24 }
 0x11c   :  { %vm908_vm3 = vcmp.eq.s32.totalorder %v225_v13, 3  ;;  %vm912_vm4 = vcmp.gt.s32.totalorder %v224_v14, 0  ;;  %v285_v39 = vmax.f32 %v520_v31, 0.0  ;;  %396 = vadd.xlane.f32.xlu1 %v339_v32  ;;  %355 = vst [vmem:[%s1160_s3 + $0x48] sm:$0xff] %v339_v32  ;;  %v293_v40 = vmax.f32 %v532_v33, 0.0  ;;  %380 = vadd.xlane.f32.xlu0 %v331_v34  ;;  %347 = vst [vmem:[%s1160_s3 + $0x8] sm:$0xff] %v331_v34 }
 0x11d   :  { %v145_v41 = vpop.f32.mrb[3].mxu0  ;;  %v185_v42 = vpop.f32.mrb[3].mxu1  ;;  %v330_v43 = vsel %vm314_vm2, %v298_v35, 0.0  ;;  %vm322_vm5 = vmand %vm810_vm6, %vm274_vm1  ;;  %vm925_vm7 = vcmp.gt.s32.totalorder %v225_v13, 0  ;;  %vm929_vm8 = vcmp.eq.s32.totalorder %v224_v14, 3  ;;  %vm933_vm9 = vcmp.eq.s32.totalorder %v233_v22, 3 }
 0x11e   :  { %v1215_v44 = vsel %vm925_vm7, 4294967295, %v1214_v44  ;;  %v1217_v45 = vsel %vm929_vm8, 4294967295, %v1216_v45  ;;  %v1219_v46 = vsel %vm933_vm9, 4294967295, %v1218_v46  ;;  %v284_v47 = vmax.f32 %v145_v41, 0.0  ;;  %346 = vst [vmem:[%s1160_s3] sm:$0xff] %v330_v43  ;;  %v362_v35 = vld [vmem:[%s1158_s4] sm:$0xff] }
 0x11f   :  { %v292_v48 = vmax.f32 %v185_v42, 0.0  ;;  %vm269_vm11 = vcmp.gt.f32.partialorder %v520_v31, 0.1  ;;  %v338_v49 = vsel %vm322_vm5, %v306_v36, 0.0  ;;  %vm940_vm6 = vcmp.gt.s32.totalorder %v233_v22, 0  ;;  %v523_v55 = vpop.f32.mrb[4].mxu0 }
 0x120   :  { %v1221_v50 = vsel %vm940_vm6, 4294967295, %v1220_v50  ;;  %vm1222_vm12 = vnez %v1181_v1  ;;  %vm1223_vm13 = vnez %v1179_v0  ;;  %354 = vst [vmem:[%s1160_s3 + $0x40] sm:$0xff] %v338_v49  ;;  %vm277_vm2 = vcmp.gt.f32.partialorder %v532_v33, 0.1  ;;  %v535_v56 = vpop.f32.mrb[4].mxu1  ;;  %378 = vadd.xlane.f32.xlu0 %v330_v43  ;;  %v155_v61 = vpop.f32.mrb[5].mxu0 }
 0x121   :  { %v301_v51 = vsel %vm1222_vm12, %v520_v31, %v285_v39  ;;  %vm317_vm1 = vmand %vm1223_vm13, %vm269_vm11  ;;  %vm1224_vm9 = vnez %v1187_v5  ;;  %vm276_vm8 = vcmp.gt.f32.partialorder %v185_v42, 0.1  ;;  %vm953_vm5 = vcmp.gt.s32.totalorder %v232_v30, 0  ;;  %v195_v63 = vpop.f32.mrb[5].mxu1  ;;  %v365_v36 = vld [vmem:[%s1158_s4 + $0x18] sm:$0xff] }
 0x122   :  { %v309_v52 = vsel %vm1224_vm9, %v532_v33, %v293_v40  ;;  %v1226_v53 = vsel %vm953_vm5, 4294967295, %v1225_v53  ;;  %v333_v54 = vsel %vm317_vm1, %v301_v51, 0.0  ;;  %vm1227_vm12 = vnez %v1185_v4 }
 0x123   :  { %vm325_vm6 = vmand %vm1227_vm12, %vm277_vm2  ;;  %vm1228_vm11 = vnez %v1191_v7  ;;  %vm268_vm13 = vcmp.gt.f32.partialorder %v145_v41, 0.1  ;;  %vm1229_vm7 = vnez %v1183_v2  ;;  %384 = vadd.xlane.f32.xlu1 %v333_v54  ;;  %349 = vst [vmem:[%s1160_s3 + $0x18] sm:$0xff] %v333_v54  ;;  %v287_v59 = vmax.f32 %v523_v55, 0.0  ;;  %v538_v9 = vpop.f32.mrb[6].mxu1  ;;  %v366_v54 = vld [vmem:[%s1158_s4 + $0x20] sm:$0xff] }
 0x124   :  { %v308_v57 = vsel %vm1228_vm11, %v185_v42, %v292_v48  ;;  %v300_v58 = vsel %vm1229_vm7, %v145_v41, %v284_v47  ;;  %v341_v60 = vsel %vm325_vm6, %v309_v52, 0.0  ;;  %v295_v62 = vmax.f32 %v535_v56, 0.0  ;;  %394 = vadd.xlane.f32.xlu0 %v338_v49  ;;  %v205_v15 = vpop.f32.mrb[7].mxu1  ;;  %v370_v41 = vld [vmem:[%s1158_s4 + $0x40] sm:$0xff]  ;;  %v373_v42 = vld [vmem:[%s1158_s4 + $0x58] sm:$0xff]  ;;  %v372_v47 = vld [vmem:[%s1158_s4 + $0x50] sm:$0xff] }
 0x125   :  { %vm1230_vm9 = vnez %v1189_v6  ;;  %vm969_vm2 = vcmp.eq.s32.totalorder %v232_v30, 3  ;;  %v1231_v0 = vmov 0  ;;  %357 = vst [vmem:[%s1160_s3 + $0x58] sm:$0xff] %v341_v60  ;;  %v286_v1 = vmax.f32 %v155_v61, 0.0  ;;  %v526_v6 = vpop.f32.mrb[6].mxu0  ;;  %v363_v30 = vld [vmem:[%s1158_s4 + $0x8] sm:$0xff] }
 0x126   :  { %vm324_vm1 = vmand %vm1230_vm9, %vm276_vm8  ;;  %v1232_v0 = vsel %vm969_vm2, 4294967295, %v1231_v0  ;;  %v294_v2 = vmax.f32 %v195_v63, 0.0  ;;  %vm1233_vm7 = vnez %v1193_v8  ;;  %vm271_vm12 = vcmp.gt.f32.partialorder %v523_v55, 0.1  ;;  %v165_v13 = vpop.f32.mrb[7].mxu0  ;;  %v364_v48 = vld [vmem:[%s1158_s4 + $0x10] sm:$0xff] }
 0x127   :  { %v340_v3 = vsel %vm324_vm1, %v308_v57, 0.0  ;;  %vm316_vm6 = vmand %vm1233_vm7, %vm268_vm13  ;;  %vm1234_vm8 = vnez %v1197_v12  ;;  %vm1235_vm11 = vnez %v1195_v11  ;;  %vm270_vm5 = vcmp.gt.f32.partialorder %v155_v61, 0.1  ;;  %400 = vadd.xlane.f32.xlu1 %v341_v60  ;;  %v374_v60 = vld [vmem:[%s1158_s4 + $0x60] sm:$0xff] }
 0x128   :  { %356 = vst [vmem:[%s1160_s3 + $0x50] sm:$0xff] %v340_v3  ;;  %v332_v4 = vsel %vm316_vm6, %v300_v58, 0.0  ;;  %v303_v5 = vsel %vm1234_vm8, %v523_v55, %v287_v59  ;;  %vm319_vm9 = vmand %vm1235_vm11, %vm271_vm12  ;;  %vm279_vm2 = vcmp.gt.f32.partialorder %v535_v56, 0.1  ;;  %v302_v8 = vsel %vm872_vm15, %v155_v61, %v286_v1  ;;  %398 = vadd.xlane.f32.xlu0 %v340_v3  ;;  %v375_v59 = vld [vmem:[%s1158_s4 + $0x68] sm:$0xff]  ;;  %v369_v1 = vld [vmem:[%s1158_s4 + $0x38] sm:$0xff] }
 0x129   :  { %348 = vst [vmem:[%s1160_s3 + $0x10] sm:$0xff] %v332_v4  ;;  %v335_v7 = vsel %vm319_vm9, %v303_v5, 0.0  ;;  %vm1236_vm13 = vnez %v1199_v19  ;;  %vm1237_vm7 = vnez %v1203_v21  ;;  %vm278_vm6 = vcmp.gt.f32.partialorder %v195_v63, 0.1  ;;  %vm327_vm15 = vmand %vm883_vm10, %vm279_vm2 }
 0x12a   :  { %vm318_vm1 = vmand %vm1236_vm13, %vm270_vm5  ;;  %v311_v10 = vsel %vm1237_vm7, %v535_v56, %v295_v62  ;;  %v289_v11 = vmax.f32 %v526_v6, 0.0  ;;  %351 = vst [vmem:[%s1160_s3 + $0x28] sm:$0xff] %v335_v7  ;;  %v297_v14 = vmax.f32 %v538_v9, 0.0  ;;  %v310_v16 = vsel %vm887_vm0, %v195_v63, %v294_v2  ;;  %v368_v2 = vld [vmem:[%s1158_s4 + $0x30] sm:$0xff] }
 0x12b   :  { %v334_v12 = vsel %vm318_vm1, %v302_v8, 0.0  ;;  %vm272_vm5 = vcmp.gt.f32.partialorder %v165_v13, 0.1  ;;  %v288_v17 = vmax.f32 %v165_v13, 0.0  ;;  %vm280_vm12 = vcmp.gt.f32.partialorder %v205_v15, 0.1  ;;  %vm326_vm8 = vmand %vm897_vm14, %vm278_vm6  ;;  %382 = vadd.xlane.f32.xlu1 %v332_v4 }
 0x12c   :  { %350 = vst [vmem:[%s1160_s3 + $0x20] sm:$0xff] %v334_v12  ;;  %v296_v18 = vmax.f32 %v205_v15, 0.0  ;;  %v343_v19 = vsel %vm327_vm15, %v311_v10, 0.0  ;;  %v342_v20 = vsel %vm326_vm8, %v310_v16, 0.0  ;;  %vm273_vm11 = vcmp.gt.f32.partialorder %v526_v6, 0.1  ;;  %vm320_vm0 = vmand %vm912_vm4, %vm272_vm5  ;;  %386 = vadd.xlane.f32.xlu0 %v334_v12 }
 0x12d   :  { %v305_v21 = vsel %vm908_vm3, %v526_v6, %v289_v11  ;;  %359 = vst [vmem:[%s1160_s3 + $0x68] sm:$0xff] %v343_v19  ;;  %358 = vst [vmem:[%s1160_s3 + $0x60] sm:$0xff] %v342_v20  ;;  %vm1238_vm10 = vnez %v1215_v44  ;;  %vm1239_vm2 = vnez %v1217_v45  ;;  %vm281_vm9 = vcmp.gt.f32.partialorder %v538_v9, 0.1  ;;  %v376_v8 = vld [vmem:[%s1158_s4 + $0x70] sm:$0xff] }
 0x12e   :  { %vm321_vm14 = vmand %vm1238_vm10, %vm273_vm11  ;;  %v304_v22 = vsel %vm1239_vm2, %v165_v13, %v288_v17  ;;  %vm1240_vm3 = vnez %v1219_v46  ;;  %vm1241_vm4 = vnez %v1232_v0  ;;  %vm1242_vm13 = vnez %v1221_v50 }
 0x12f   :  { %v313_v23 = vsel %vm1240_vm3, %v538_v9, %v297_v14  ;;  %v312_v24 = vsel %vm1241_vm4, %v205_v15, %v296_v18  ;;  %v337_v25 = vsel %vm321_vm14, %v305_v21, 0.0  ;;  %v336_v26 = vsel %vm320_vm0, %v304_v22, 0.0  ;;  %vm329_vm1 = vmand %vm1242_vm13, %vm281_vm9  ;;  %388 = vadd.xlane.f32.xlu1 %v335_v7  ;;  %v377_v7 = vld [vmem:[%s1158_s4 + $0x78] sm:$0xff] }
 0x130   :  { %353 = vst [vmem:[%s1160_s3 + $0x38] sm:$0xff] %v337_v25  ;;  %352 = vst [vmem:[%s1160_s3 + $0x30] sm:$0xff] %v336_v26  ;;  %v345_v27 = vsel %vm329_vm1, %v313_v23, 0.0  ;;  %vm1243_vm7 = vnez %v1226_v53  ;;  %402 = vadd.xlane.f32.xlu0 %v342_v20  ;;  %vm1244_vm15 = vcmask 7168   ;;  %v367_v53 = vld [vmem:[%s1158_s4 + $0x28] sm:$0xff] }
 0x131   :  { %vm328_vm6 = vmand %vm1243_vm7, %vm280_vm12  ;;  %361 = vst [vmem:[%s1160_s3 + $0x78] sm:$0xff] %v345_v27 }
 0x132   :  { %v344_v28 = vsel %vm328_vm6, %v312_v24, 0.0  ;;  %vm1245_vm5 = vmmov %vm1244_vm15 }
 0x133   :  { %360 = vst [vmem:[%s1160_s3 + $0x70] sm:$0xff] %v344_v28  ;;  %404 = vadd.xlane.f32.xlu1 %v343_v19  ;;  %vm1246_vm12 = vmmov %vm1245_vm5 }
 0x134   :  { %390 = vadd.xlane.f32.xlu0 %v336_v26  ;;  %vm1247_vm8 = vmmov %vm1245_vm5 }
 0x135   :  { %vm1248_vm11 = vmmov %vm1245_vm5 }
 0x136   :  { %vm1249_vm0 = vmmov %vm1245_vm5 }
 0x137   :  { %392 = vadd.xlane.f32.xlu1 %v337_v25  ;;  %vm1250_vm10 = vmmov %vm1249_vm0 }
 0x138   :  { %406 = vadd.xlane.f32.xlu0 %v344_v28  ;;  %vm1251_vm14 = vmmov %vm1249_vm0 }
 0x139   :  { %vm1252_vm2 = vmmov %vm1249_vm0 }
 0x13a   :  { %vm1253_vm9 = vmmov %vm1249_vm0 }
 0x13b   :  { %408 = vadd.xlane.f32.xlu1 %v345_v27  ;;  %vm1254_vm3 = vmmov %vm1249_vm0 }
 0x13c   :  { %vm1255_vm4 = vmmov %vm1249_vm0 }
 0x13d   :  { %vm1256_vm13 = vmmov %vm1249_vm0 }
 0x13e   :  { %vm1257_vm1 = vmmov %vm1249_vm0 }
 0x13f   :  { %vm1258_vm7 = vmmov %vm1249_vm0 }
 0x140   :  { %vm1259_vm6 = vmmov %vm1249_vm0 }
 0x1a9   :  { %v397_v31 = vpop.xlane.xlu1 %396  ;;  %v381_v32 = vpop.xlane.xlu0 %380 }
 0x1aa   :  { %v419_v33 = vadd.f32 %v397_v31, %v371_v29  ;;  %v411_v34 = vadd.f32 %v381_v32, %v363_v30 }
 0x1ac   :  { %436 = vst.msk [vmem:[%s1158_s4 + $0x48] sm:$0xff] %vm1244_vm15, %v419_v33 }
 0x1ad   :  { %428 = vst.msk [vmem:[%s1158_s4 + $0x8] sm:$0xff] %vm1245_vm5, %v411_v34  ;;  %v379_v37 = vpop.xlane.xlu0 %378 }
 0x1ae   :  { %v410_v39 = vadd.f32 %v379_v37, %v362_v35 }
 0x1b0   :  { %v385_v38 = vpop.xlane.xlu1 %384  ;;  %427 = vst.msk [vmem:[%s1158_s4] sm:$0xff] %vm1246_vm12, %v410_v39 }
 0x1b1   :  { %v413_v40 = vadd.f32 %v385_v38, %v365_v36  ;;  %v395_v43 = vpop.xlane.xlu0 %394 }
 0x1b2   :  { %v418_v45 = vadd.f32 %v395_v43, %v370_v41 }
 0x1b3   :  { %430 = vst.msk [vmem:[%s1158_s4 + $0x18] sm:$0xff] %vm1247_vm8, %v413_v40 }
 0x1b4   :  { %v401_v44 = vpop.xlane.xlu1 %400  ;;  %435 = vst.msk [vmem:[%s1158_s4 + $0x40] sm:$0xff] %vm1248_vm11, %v418_v45 }
 0x1b5   :  { %v421_v46 = vadd.f32 %v401_v44, %v373_v42  ;;  %v399_v49 = vpop.xlane.xlu0 %398 }
 0x1b6   :  { %v420_v51 = vadd.f32 %v399_v49, %v372_v47 }
 0x1b7   :  { %438 = vst.msk [vmem:[%s1158_s4 + $0x58] sm:$0xff] %vm1249_vm0, %v421_v46 }
 0x1b8   :  { %v383_v50 = vpop.xlane.xlu1 %382  ;;  %437 = vst.msk [vmem:[%s1158_s4 + $0x50] sm:$0xff] %vm1250_vm10, %v420_v51 }
 0x1b9   :  { %v412_v52 = vadd.f32 %v383_v50, %v364_v48  ;;  %v387_v56 = vpop.xlane.xlu0 %386 }
 0x1ba   :  { %v414_v58 = vadd.f32 %v387_v56, %v366_v54 }
 0x1bb   :  { %429 = vst.msk [vmem:[%s1158_s4 + $0x10] sm:$0xff] %vm1251_vm14, %v412_v52 }
 0x1bc   :  { %v389_v55 = vpop.xlane.xlu1 %388  ;;  %431 = vst.msk [vmem:[%s1158_s4 + $0x20] sm:$0xff] %vm1253_vm9, %v414_v58 }
 0x1bd   :  { %v415_v57 = vadd.f32 %v389_v55, %v367_v53  ;;  %v403_v62 = vpop.xlane.xlu0 %402 }
 0x1be   :  { %v422_v0 = vadd.f32 %v403_v62, %v374_v60 }
 0x1bf   :  { %432 = vst.msk [vmem:[%s1158_s4 + $0x28] sm:$0xff] %vm1252_vm2, %v415_v57 }
 0x1c0   :  { %v405_v61 = vpop.xlane.xlu1 %404  ;;  %439 = vst.msk [vmem:[%s1158_s4 + $0x60] sm:$0xff] %vm1255_vm4, %v422_v0 }
 0x1c1   :  { %v423_v63 = vadd.f32 %v405_v61, %v375_v59  ;;  %v391_v4 = vpop.xlane.xlu0 %390 }
 0x1c2   :  { %v416_v6 = vadd.f32 %v391_v4, %v368_v2 }
 0x1c3   :  { %440 = vst.msk [vmem:[%s1158_s4 + $0x68] sm:$0xff] %vm1254_vm3, %v423_v63 }
 0x1c4   :  { %v393_v3 = vpop.xlane.xlu1 %392  ;;  %433 = vst.msk [vmem:[%s1158_s4 + $0x30] sm:$0xff] %vm1257_vm1, %v416_v6 }
 0x1c5   :  { %v417_v5 = vadd.f32 %v393_v3, %v369_v1  ;;  %v407_v10 = vpop.xlane.xlu0 %406 }
 0x1c6   :  { %v424_v12 = vadd.f32 %v407_v10, %v376_v8 }
 0x1c7   :  { %434 = vst.msk [vmem:[%s1158_s4 + $0x38] sm:$0xff] %vm1256_vm13, %v417_v5 }
 0x1c8   :  { %v409_v9 = vpop.xlane.xlu1 %408  ;;  %441 = vst.msk [vmem:[%s1158_s4 + $0x70] sm:$0xff] %vm1259_vm6, %v424_v12 }
 0x1c9   :  { %v425_v11 = vadd.f32 %v409_v9, %v377_v7 }
 0x1cb   :  { %442 = vst.msk [vmem:[%s1158_s4 + $0x78] sm:$0xff] %vm1258_vm7, %v425_v11 }

// kernel: _cmg_core.12
= control target key start
LH: loop header
LB: loop body
LE: loop exit
PB: predicated region body
PF: predicated region fallthrough
CT: control target
= control target key end

     0   :  { %7 = vsyncpa [#allocation4], 0  ;;  %s473_s9 = smov [#allocation3]   ;;  %s599_s0 = inlined_call_operand.vmem [shape: f32[128,128], index: 0, kind: input, shape index: {}]   ;;  %s600_s1 = inlined_call_operand.hbm [shape: f32[128,128], index: 1, kind: input, shape index: {}]   ;;  %s601_s2 = inlined_call_operand.vmem [shape: f32[128,128], index: 2, kind: output, shape index: {}]  }
   0x1   :  { %s15_s10 = sshll.u32 %s473_s9, 4  ;;  %s449_s13 = scalar_lea.hbm %s600_s1, 2048  ;;  %s16_s10 = int_to_ptr.vmem [resolvable:$true] %s15_s10 }
   0x2   :  { %p450_p0 = scmp.ne.s32.totalorder %s600_s1, %s449_s13  ;;  %p453_p1 = scmp.lt.u32.totalorder %s449_s13, %s600_s1 }
   0x4   :  { %p455_p2 = pnand %p453_p1, %p450_p0 }
   0x6   :  { %458 = shalt.err (!%p455_p2)
}
   0x7   :  { %s459_s18 = scalar_lea.vmem %s16_s10, 2048  ;;  %p464_p4 = scmp.lt.s32.totalorder %s16_s10, %s16_s10 }
   0x8   :  { %p460_p3 = scmp.ne.s32.totalorder %s16_s10, %s459_s18  ;;  %p465_p5 = scmp.lt.s32.totalorder %s459_s18, %s459_s18 }
   0xa   :  { %p466_p6 = por %p465_p5, %p464_p4 }
   0xc   :  { %p467_p7 = pnand %p466_p6, %p460_p3 }
   0xe   :  { %470 = shalt.err (!%p467_p7)
}
   0xf   :  { %s474_s19 = smov 128   ;;  %s475_s20 = smov 8  }
  0x10   :  { %21 = dma.hbm_to_vmem [thread:$0]  %s600_s1, 2048, %s16_s10, [#allocation4], %s474_s19, %s474_s19, %s475_s20  }
  0x11   :  { %471 = dma.done.wait [#allocation4], 2048  }
  0x12   :  { %472 = vsyncadd [#allocation4], 4294965248  ;;  %v77_v0 = vld [vmem:[#allocation3] sm:$0xff]  ;;  %v78_v1 = vld [vmem:[#allocation3 + $0x8] sm:$0xff] }
  0x13   :  { %v79_v2 = vld [vmem:[#allocation3 + $0x10] sm:$0xff]  ;;  %v398_v3 = vpack.c.bf16 %v78_v1, %v77_v0  ;;  %v80_v4 = vld [vmem:[#allocation3 + $0x18] sm:$0xff]  ;;  %v81_v6 = vld [vmem:[#allocation3 + $0x20] sm:$0xff] }
  0x14   :  { %v402_v5 = vpack.c.bf16 %v80_v4, %v79_v2  ;;  %v82_v7 = vld [vmem:[#allocation3 + $0x28] sm:$0xff]  ;;  %v61_v9 = vld [vmem:[%s599_s0] sm:$0xff]  ;;  %v83_v11 = vld [vmem:[#allocation3 + $0x30] sm:$0xff] }
  0x15   :  { %399 = vmatprep.subr.bf16.mxu0 %v398_v3  ;;  %430 = vmatprep.subr.bf16.mxu1 %v398_v3  ;;  %v406_v8 = vpack.c.bf16 %v82_v7, %v81_v6  ;;  %v69_v10 = vld [vmem:[%s599_s0 + $0x40] sm:$0xff]  ;;  %v84_v12 = vld [vmem:[#allocation3 + $0x38] sm:$0xff]  ;;  %v86_v15 = vld [vmem:[#allocation3 + $0x48] sm:$0xff] }
  0x16   :  { %401 = vmatpush3.bf16.msra.mxu0 %v398_v3  ;;  %438 = vmatpush3.bf16.msra.mxu1 %v398_v3  ;;  %v410_v13 = vpack.c.bf16 %v84_v12, %v83_v11  ;;  %v85_v14 = vld [vmem:[#allocation3 + $0x40] sm:$0xff]  ;;  %v87_v17 = vld [vmem:[#allocation3 + $0x50] sm:$0xff]  ;;  %v88_v18 = vld [vmem:[#allocation3 + $0x58] sm:$0xff] }
  0x17   :  { %403 = vmatprep.subr.bf16.mxu0 %v402_v5  ;;  %431 = vmatprep.subr.bf16.mxu1 %v402_v5  ;;  %v414_v16 = vpack.c.bf16 %v86_v15, %v85_v14  ;;  %v418_v19 = vpack.c.bf16 %v88_v18, %v87_v17  ;;  %v89_v20 = vld [vmem:[#allocation3 + $0x60] sm:$0xff]  ;;  %v90_v21 = vld [vmem:[#allocation3 + $0x68] sm:$0xff]  ;;  %v91_v23 = vld [vmem:[#allocation3 + $0x70] sm:$0xff] }
  0x18   :  { %374 = vmatprep.mubr.f32.mxu0 %v61_v9  ;;  %386 = vmatprep.mubr.f32.mxu1 %v69_v10  ;;  %v422_v22 = vpack.c.bf16 %v90_v21, %v89_v20  ;;  %v92_v24 = vld [vmem:[#allocation3 + $0x78] sm:$0xff]  ;;  %v62_v26 = vld [vmem:[%s599_s0 + $0x8] sm:$0xff]  ;;  %v63_v28 = vld [vmem:[%s599_s0 + $0x10] sm:$0xff] }
  0x19   :  { %v426_v25 = vpack.c.bf16 %v92_v24, %v91_v23  ;;  %v70_v27 = vld [vmem:[%s599_s0 + $0x48] sm:$0xff]  ;;  %v71_v29 = vld [vmem:[%s599_s0 + $0x50] sm:$0xff]  ;;  %v64_v30 = vld [vmem:[%s599_s0 + $0x18] sm:$0xff] }
  0x1a   :  { %405 = vmatpush3.bf16.msra.mxu0 %v402_v5  ;;  %439 = vmatpush3.bf16.msra.mxu1 %v402_v5  ;;  %v72_v31 = vld [vmem:[%s599_s0 + $0x58] sm:$0xff]  ;;  %v65_v32 = vld [vmem:[%s599_s0 + $0x20] sm:$0xff]  ;;  %v66_v34 = vld [vmem:[%s599_s0 + $0x28] sm:$0xff] }
  0x1b   :  { %407 = vmatprep.subr.bf16.mxu0 %v406_v8  ;;  %432 = vmatprep.subr.bf16.mxu1 %v406_v8  ;;  %v73_v33 = vld [vmem:[%s599_s0 + $0x60] sm:$0xff]  ;;  %v74_v35 = vld [vmem:[%s599_s0 + $0x68] sm:$0xff]  ;;  %v67_v36 = vld [vmem:[%s599_s0 + $0x30] sm:$0xff] }
  0x1c   :  { %v75_v37 = vld [vmem:[%s599_s0 + $0x70] sm:$0xff]  ;;  %v68_v38 = vld [vmem:[%s599_s0 + $0x38] sm:$0xff] }
  0x1d   :  { %v76_v39 = vld [vmem:[%s599_s0 + $0x78] sm:$0xff] }
  0x1e   :  { %409 = vmatpush3.bf16.msra.mxu0 %v406_v8  ;;  %440 = vmatpush3.bf16.msra.mxu1 %v406_v8 }
  0x1f   :  { %411 = vmatprep.subr.bf16.mxu0 %v410_v13  ;;  %433 = vmatprep.subr.bf16.mxu1 %v410_v13 }
  0x22   :  { %413 = vmatpush3.bf16.msra.mxu0 %v410_v13  ;;  %441 = vmatpush3.bf16.msra.mxu1 %v410_v13 }
  0x23   :  { %415 = vmatprep.subr.bf16.mxu0 %v414_v16  ;;  %434 = vmatprep.subr.bf16.mxu1 %v414_v16 }
  0x26   :  { %417 = vmatpush3.bf16.msra.mxu0 %v414_v16  ;;  %442 = vmatpush3.bf16.msra.mxu1 %v414_v16 }
  0x27   :  { %419 = vmatprep.subr.bf16.mxu0 %v418_v19  ;;  %435 = vmatprep.subr.bf16.mxu1 %v418_v19 }
  0x2a   :  { %421 = vmatpush3.bf16.msra.mxu0 %v418_v19  ;;  %443 = vmatpush3.bf16.msra.mxu1 %v418_v19 }
  0x2b   :  { %423 = vmatprep.subr.bf16.mxu0 %v422_v22  ;;  %436 = vmatprep.subr.bf16.mxu1 %v422_v22 }
  0x2e   :  { %425 = vmatpush3.bf16.msra.mxu0 %v422_v22  ;;  %444 = vmatpush3.bf16.msra.mxu1 %v422_v22 }
  0x2f   :  { %427 = vmatprep.subr.bf16.mxu0 %v426_v25  ;;  %437 = vmatprep.subr.bf16.mxu1 %v426_v25 }
  0x32   :  { %429 = vmatpush3.bf16.msra.mxu0 %v426_v25  ;;  %445 = vmatpush3.bf16.msra.mxu1 %v426_v25 }
  0x35   :  { %375 = vmatmul.mubr.f32.vlgmr.msra.gmra.mrb[0].mxu0 %v62_v26  ;;  %387 = vmatmul.mubr.f32.vlgmr.msra.gmra.mrb[0].mxu1 %v70_v27 }
  0x36   :  { %377 = vmatprep.mubr.f32.mxu0 %v63_v28  ;;  %389 = vmatprep.mubr.f32.mxu1 %v71_v29 }
  0x39   :  { %378 = vmatmul.mubr.f32.gmra.mrb[2].mxu0 %v64_v30  ;;  %390 = vmatmul.mubr.f32.gmra.mrb[2].mxu1 %v72_v31 }
  0x3a   :  { %380 = vmatprep.mubr.f32.mxu0 %v65_v32  ;;  %392 = vmatprep.mubr.f32.mxu1 %v73_v33 }
  0x3d   :  { %381 = vmatmul.mubr.f32.gmra.mrb[4].mxu0 %v66_v34  ;;  %393 = vmatmul.mubr.f32.gmra.mrb[4].mxu1 %v74_v35 }
  0x3e   :  { %383 = vmatprep.mubr.f32.mxu0 %v67_v36  ;;  %395 = vmatprep.mubr.f32.mxu1 %v75_v37 }
  0x41   :  { %384 = vmatmul.mubr.f32.gmra.mrb[6].mxu0 %v68_v38  ;;  %396 = vmatmul.mubr.f32.gmra.mrb[6].mxu1 %v76_v39 }
 0x108   :  { %v376_v40 = vpop.f32.mrb[0].mxu0  ;;  %v388_v41 = vpop.f32.mrb[0].mxu1 }
 0x109   :  { %290 = vst [vmem:[%s601_s2 + $0x8] sm:$0xff] %v376_v40  ;;  %298 = vst [vmem:[%s601_s2 + $0x48] sm:$0xff] %v388_v41  ;;  %v159_v42 = vpop.f32.mrb[1].mxu0  ;;  %v199_v43 = vpop.f32.mrb[1].mxu1 }
 0x10a   :  { %289 = vst [vmem:[%s601_s2] sm:$0xff] %v159_v42  ;;  %297 = vst [vmem:[%s601_s2 + $0x40] sm:$0xff] %v199_v43 }
 0x10c   :  { %v379_v44 = vpop.f32.mrb[2].mxu0  ;;  %v391_v45 = vpop.f32.mrb[2].mxu1 }
 0x10d   :  { %292 = vst [vmem:[%s601_s2 + $0x18] sm:$0xff] %v379_v44  ;;  %300 = vst [vmem:[%s601_s2 + $0x58] sm:$0xff] %v391_v45  ;;  %v169_v46 = vpop.f32.mrb[3].mxu0  ;;  %v209_v47 = vpop.f32.mrb[3].mxu1 }
 0x10e   :  { %291 = vst [vmem:[%s601_s2 + $0x10] sm:$0xff] %v169_v46  ;;  %299 = vst [vmem:[%s601_s2 + $0x50] sm:$0xff] %v209_v47 }
 0x110   :  { %v382_v48 = vpop.f32.mrb[4].mxu0  ;;  %v394_v49 = vpop.f32.mrb[4].mxu1 }
 0x111   :  { %294 = vst [vmem:[%s601_s2 + $0x28] sm:$0xff] %v382_v48  ;;  %302 = vst [vmem:[%s601_s2 + $0x68] sm:$0xff] %v394_v49  ;;  %v179_v50 = vpop.f32.mrb[5].mxu0  ;;  %v219_v51 = vpop.f32.mrb[5].mxu1 }
 0x112   :  { %293 = vst [vmem:[%s601_s2 + $0x20] sm:$0xff] %v179_v50  ;;  %301 = vst [vmem:[%s601_s2 + $0x60] sm:$0xff] %v219_v51 }
 0x114   :  { %v385_v52 = vpop.f32.mrb[6].mxu0  ;;  %v397_v53 = vpop.f32.mrb[6].mxu1 }
 0x115   :  { %296 = vst [vmem:[%s601_s2 + $0x38] sm:$0xff] %v385_v52  ;;  %304 = vst [vmem:[%s601_s2 + $0x78] sm:$0xff] %v397_v53  ;;  %v189_v54 = vpop.f32.mrb[7].mxu0  ;;  %v229_v55 = vpop.f32.mrb[7].mxu1 }
 0x116   :  { %295 = vst [vmem:[%s601_s2 + $0x30] sm:$0xff] %v189_v54  ;;  %303 = vst [vmem:[%s601_s2 + $0x70] sm:$0xff] %v229_v55 }
 0x117   :  { %309 = vsyncpa [#allocation4], 1 }

</bundles_post_ra>
